<compile_context>
chip_gen: v6e
topology: v6e:2x2x1
jax: 0.10.0
libtpu: 0.0.40
codegen_flags: <defaults>
</compile_context>

<pallas_src>
import math

import jax
import jax.numpy as jnp
from jax import lax
from jax.experimental import pallas as pl
from jax.experimental.pallas import tpu as pltpu

# ---- problem sizes (small, consistent with the module's forward) ------------
B = 2          # batch
S = 8          # sequence length
H = 32         # hidden_dim
NUM_HEADS = 4  # num_heads
D_FF = 64      # d_ff
DH = H // NUM_HEADS
LN_EPS = 1e-5

PAD_W = 128    # lane-dense width every kernel operand is padded to
N_VEC_ROWS = 8
VEC_W = 128
INV_H = 1.0 / H


def _layer_norm_padded(x, gamma, beta):
    """LayerNorm over the H real columns of a 128-wide, zero-padded tensor.

    Requires: x[..., H:] == 0, gamma[..., H:] == 0, beta[..., H:] == 0.
    Uses E[x^2] - mean^2 so the zero padding drops out of the statistics, and
    the zero-padded gamma/beta keep the padded output columns exactly zero.
    """
    mean = jnp.sum(x, axis=-1, keepdims=True) * INV_H
    ex2 = jnp.sum(x * x, axis=-1, keepdims=True) * INV_H
    var = ex2 - mean * mean
    inv = lax.rsqrt(var + LN_EPS)
    return (x - mean) * inv * gamma + beta


def encoder_layer_kernel(x_ref, bias_ref, wqkv_ref, wo_ref, w1_ref, w2_ref,
                         vec_ref, out_ref):
    x = x_ref[...]                       # (BB, S, 128), cols >= H are zero
    mask_bias = bias_ref[...][..., :S]   # (BB, S, S) additive bias (0 / -1e9)
    vec = vec_ref[...]                   # (8, 128) packed biases / LN params

    bqkv = vec[0:1, :]   # q part pre-scaled; zero beyond 3H
    bo   = vec[1:2, :]   # zero beyond H
    g1   = vec[2:3, :]
    be1  = vec[3:4, :]
    b1   = vec[4:5, :]   # zero beyond D_FF
    b2   = vec[5:6, :]
    g2   = vec[6:7, :]
    be2  = vec[7:8, :]

    # ---- fused QKV projection (one lane-dense 128x128 MXU pass) -------------
    qkv = jnp.dot(x, wqkv_ref[...], preferred_element_type=jnp.float32) + bqkv
    q = qkv[..., 0 * H:1 * H]            # (BB, S, H) -- pre-scaled by 1/sqrt(DH)
    k = qkv[..., 1 * H:2 * H]
    v = qkv[..., 2 * H:3 * H]

    # ---- multi-head attention (static 4-iter head loop) ---------------------
    bmm_qk = (((2,), (2,)), ((0,), (0,)))   # contract DH,   batch over BB
    bmm_pv = (((2,), (1,)), ((0,), (0,)))   # contract keys, batch over BB
    heads = []
    for h in range(NUM_HEADS):
        sl = slice(h * DH, (h + 1) * DH)
        qh = q[..., sl]
        kh = k[..., sl]
        vh = v[..., sl]
        scores = lax.dot_general(qh, kh, bmm_qk,
                                 preferred_element_type=jnp.float32)  # (BB,S,S)
        scores = scores + mask_bias
        scores = scores - jnp.max(scores, axis=-1, keepdims=True)
        p = jnp.exp(scores)
        p = p * pl.reciprocal(jnp.sum(p, axis=-1, keepdims=True), approx=True)
        heads.append(lax.dot_general(p, vh, bmm_pv,
                                     preferred_element_type=jnp.float32))

    # single output projection: lane-concat heads (one vreg) + one K=32 matmul
    attn = jnp.concatenate(heads, axis=-1)                      # (BB, S, H)
    attn = jnp.dot(attn, wo_ref[...],
                   preferred_element_type=jnp.float32) + bo     # (BB, S, 128)

    # residual + norm1  (dropout = identity, eval mode)
    h1 = _layer_norm_padded(x + attn, g1, be1)                  # pad cols == 0

    # ---- position-wise feed-forward -----------------------------------------
    f = jnp.dot(h1, w1_ref[...], preferred_element_type=jnp.float32) + b1
    f = jnp.maximum(f, 0.0)  # ReLU
    f = jnp.dot(f, w2_ref[...], preferred_element_type=jnp.float32) + b2

    # residual + norm2  (dropout = identity, eval mode) -> lane-dense store
    out_ref[...] = _layer_norm_padded(h1 + f, g2, be2)


def encoder_layer(x, mask, fused_params, *, per_batch_grid=False):
    """x: (B, S, H) f32, mask: (B, S, S) f32.  Returns (B, S, H) f32."""
    wqkv, wo, w1, w2, vec = fused_params

    # Wrapper-side layout plumbing (lane-dense slabs, last dim = 128):
    x_pad = jnp.pad(x.astype(jnp.float32), ((0, 0), (0, 0), (0, PAD_W - H)))
    bias = jnp.where(mask > 0.0, 0.0, -1e9).astype(jnp.float32)
    bias = jnp.pad(bias, ((0, 0), (0, 0), (0, PAD_W - S)))

    if per_batch_grid:
        grid = (B,)
        bb = 1
        xmap = lambda b: (b, 0, 0)
    else:
        grid = (1,)
        bb = B
        xmap = lambda b: (0, 0, 0)
    wmap = lambda b: (0, 0)

    in_specs = [
        pl.BlockSpec((bb, S, PAD_W), xmap),          # x (padded)
        pl.BlockSpec((bb, S, PAD_W), xmap),          # additive mask bias (padded)
        pl.BlockSpec((PAD_W, PAD_W), wmap),          # fused wqkv (padded)
        pl.BlockSpec((H, PAD_W), wmap),              # wo (out-padded)
        pl.BlockSpec((PAD_W, PAD_W), wmap),          # w1 (padded)
        pl.BlockSpec((PAD_W, PAD_W), wmap),          # w2 (padded)
        pl.BlockSpec((N_VEC_ROWS, VEC_W), wmap),     # packed vectors
    ]
    out_specs = pl.BlockSpec((bb, S, PAD_W), xmap)

    out_pad = pl.pallas_call(
        encoder_layer_kernel,
        out_shape=jax.ShapeDtypeStruct((B, S, PAD_W), jnp.float32),
        grid_spec=pltpu.PrefetchScalarGridSpec(
            num_scalar_prefetch=0,
            grid=grid,
            in_specs=in_specs,
            out_specs=out_specs,
        ),
        compiler_params=pltpu.CompilerParams(
            dimension_semantics=("parallel",)),
    )(x_pad, bias, wqkv, wo, w1, w2, vec)

    return out_pad[..., :H]


def init_params(key):
    """Raw per-layer params, matching the PyTorch module (Linear stored (in,out))."""
    ks = jax.random.split(key, 8)
    scl_h = 1.0 / math.sqrt(H)
    scl_f = 1.0 / math.sqrt(D_FF)
    wq = jax.random.normal(ks[0], (H, H), jnp.float32) * scl_h
    wk = jax.random.normal(ks[1], (H, H), jnp.float32) * scl_h
    wv = jax.random.normal(ks[2], (H, H), jnp.float32) * scl_h
    wo = jax.random.normal(ks[3], (H, H), jnp.float32) * scl_h
    bq = jnp.zeros((1, H), jnp.float32)
    bk = jnp.zeros((1, H), jnp.float32)
    bv = jnp.zeros((1, H), jnp.float32)
    bo = jnp.zeros((1, H), jnp.float32)
    g1 = jnp.ones((1, H), jnp.float32)
    be1 = jnp.zeros((1, H), jnp.float32)
    w1 = jax.random.normal(ks[4], (H, D_FF), jnp.float32) * scl_h
    b1 = jnp.zeros((1, D_FF), jnp.float32)
    w2 = jax.random.normal(ks[5], (D_FF, H), jnp.float32) * scl_f
    b2 = jnp.zeros((1, H), jnp.float32)
    g2 = jnp.ones((1, H), jnp.float32)
    be2 = jnp.zeros((1, H), jnp.float32)
    return (wq, bq, wk, bk, wv, bv, wo, bo,
            g1, be1, w1, b1, w2, b2, g2, be2)


def fuse_params(params):
    """Host-side constant folding: fused+padded QKV weight, padded FFN/out
    weights, and a packed (8,128) vector slab (zero padding everywhere)."""
    (wq, bq, wk, bk, wv, bv, wo, bo,
     g1, be1, w1, b1, w2, b2, g2, be2) = params
    scale = 1.0 / math.sqrt(DH)
    # Fold the 1/sqrt(DH) attention scale into the q projection (weight + bias).
    wqkv = jnp.concatenate([wq * scale, wk, wv], axis=1)   # (H, 3H)
    bqkv = jnp.concatenate([bq * scale, bk, bv], axis=1)   # (1, 3H)

    # Zero-pad weights to lane-dense shapes (padding is exact: padded input
    # columns are zero and padded weight rows/cols are zero).
    wqkv_p = jnp.zeros((PAD_W, PAD_W), jnp.float32).at[:H, :3 * H].set(wqkv)
    wo_p = jnp.zeros((H, PAD_W), jnp.float32).at[:, :H].set(wo)
    w1_p = jnp.zeros((PAD_W, PAD_W), jnp.float32).at[:H, :D_FF].set(w1)
    w2_p = jnp.zeros((PAD_W, PAD_W), jnp.float32).at[:D_FF, :H].set(w2)

    vec = jnp.zeros((N_VEC_ROWS, VEC_W), jnp.float32)
    vec = vec.at[0, :3 * H].set(bqkv[0])
    vec = vec.at[1, :H].set(bo[0])
    vec = vec.at[2, :H].set(g1[0])
    vec = vec.at[3, :H].set(be1[0])
    vec = vec.at[4, :D_FF].set(b1[0])
    vec = vec.at[5, :H].set(b2[0])
    vec = vec.at[6, :H].set(g2[0])
    vec = vec.at[7, :H].set(be2[0])
    return (wqkv_p, wo_p, w1_p, w2_p, vec)


def encoder_layer_reference(x, mask, params):
    """Pure-JAX reference matching the PyTorch module (eval mode)."""
    (wq, bq, wk, bk, wv, bv, wo, bo,
     g1, be1, w1, b1, w2, b2, g2, be2) = params

    def ln(v, g, b):
        m = jnp.mean(v, axis=-1, keepdims=True)
        var = jnp.mean((v - m) ** 2, axis=-1, keepdims=True)
        return (v - m) / jnp.sqrt(var + LN_EPS) * g + b

    q = x @ wq + bq
    k = x @ wk + bk
    v = x @ wv + bv
    qh = q.reshape(B, S, NUM_HEADS, DH).transpose(0, 2, 1, 3)
    kh = k.reshape(B, S, NUM_HEADS, DH).transpose(0, 2, 1, 3)
    vh = v.reshape(B, S, NUM_HEADS, DH).transpose(0, 2, 1, 3)
    scores = jnp.einsum("bhqd,bhkd->bhqk", qh, kh) / math.sqrt(DH)
    scores = jnp.where(mask[:, None, :, :] > 0.0, scores, -1e9)
    p = jax.nn.softmax(scores, axis=-1)
    attn = jnp.einsum("bhqk,bhkd->bhqd", p, vh)
    attn = attn.transpose(0, 2, 1, 3).reshape(B, S, H) @ wo + bo
    h1 = ln(x + attn, g1, be1)
    f = jnp.maximum(h1 @ w1 + b1, 0.0) @ w2 + b2
    return ln(h1 + f, g2, be2)


if __name__ == "__main__":
    key = jax.random.PRNGKey(0)
    k_x, k_p = jax.random.split(key)
    x = jax.random.normal(k_x, (B, S, H), jnp.float32)
    # simple padding-style mask: last 2 key positions of batch 1 are masked out
    mask = jnp.ones((B, S, S), jnp.float32)
    mask = mask.at[1, :, S - 2:].set(0.0)

    params = init_params(k_p)
    fused = fuse_params(params)

    out = encoder_layer(x, mask, fused, per_batch_grid=False)
    out = jax.block_until_ready(out)
    assert out.shape == (B, S, H)
    assert bool(jnp.all(jnp.isfinite(out)))

    # Loose tolerance: covers approx-reciprocal softmax (~1e-3) and the
    # E[x^2]-mean^2 LayerNorm variance formulation.
    ref = encoder_layer_reference(x, mask, params)
    max_err = float(jnp.max(jnp.abs(out - ref)))
    assert max_err < 2e-2, f"max abs error vs reference: {max_err}"

    print("KERNEL_OK")
</pallas_src>

<mosaic_0001>
module attributes {stable_mosaic.version = 11 : i64} {
  func.func @encoder_layer_kernel(%arg0: i32, %arg1: memref<2x8x128xf32, #tpu.memory_space<vmem>>, %arg2: memref<2x8x128xf32, #tpu.memory_space<vmem>>, %arg3: memref<128x128xf32, #tpu.memory_space<vmem>>, %arg4: memref<32x128xf32, #tpu.memory_space<vmem>>, %arg5: memref<128x128xf32, #tpu.memory_space<vmem>>, %arg6: memref<128x128xf32, #tpu.memory_space<vmem>>, %arg7: memref<8x128xf32, #tpu.memory_space<vmem>>, %arg8: memref<2x8x128xf32, #tpu.memory_space<vmem>>) attributes {dimension_semantics = [#tpu.dimension_semantics<parallel>], iteration_bounds = array<i64: 1>, scalar_prefetch = 0 : i64, scratch_operands = 0 : i64, tpu.core_type = #tpu.core_type<tc>, window_params = [{pipeline_mode = #tpu.pipeline_mode<synchronous>, transform_indices = @transform_0, window_bounds = array<i64: 2, 8, 128>}, {pipeline_mode = #tpu.pipeline_mode<synchronous>, transform_indices = @transform_1, window_bounds = array<i64: 2, 8, 128>}, {pipeline_mode = #tpu.pipeline_mode<synchronous>, transform_indices = @transform_2, window_bounds = array<i64: 128, 128>}, {pipeline_mode = #tpu.pipeline_mode<synchronous>, transform_indices = @transform_3, window_bounds = array<i64: 32, 128>}, {pipeline_mode = #tpu.pipeline_mode<synchronous>, transform_indices = @transform_4, window_bounds = array<i64: 128, 128>}, {pipeline_mode = #tpu.pipeline_mode<synchronous>, transform_indices = @transform_5, window_bounds = array<i64: 128, 128>}, {pipeline_mode = #tpu.pipeline_mode<synchronous>, transform_indices = @transform_6, window_bounds = array<i64: 8, 128>}, {pipeline_mode = #tpu.pipeline_mode<synchronous>, transform_indices = @transform_7, window_bounds = array<i64: 2, 8, 128>}]} {
    %c0 = arith.constant 0 : index
    %c0_0 = arith.constant 0 : index
    %c0_1 = arith.constant 0 : index
    %0 = vector.load %arg1[%c0, %c0_0, %c0_1] : memref<2x8x128xf32, #tpu.memory_space<vmem>>, vector<2x8x128xf32>
    %c0_2 = arith.constant 0 : index
    %c0_3 = arith.constant 0 : index
    %c0_4 = arith.constant 0 : index
    %1 = vector.load %arg2[%c0_2, %c0_3, %c0_4] : memref<2x8x128xf32, #tpu.memory_space<vmem>>, vector<2x8x128xf32>
    %2 = vector.extract_strided_slice %1 {offsets = [0, 0, 0], sizes = [2, 8, 8], strides = [1, 1, 1]} : vector<2x8x128xf32> to vector<2x8x8xf32>
    %c0_5 = arith.constant 0 : index
    %c0_6 = arith.constant 0 : index
    %3 = vector.load %arg7[%c0_5, %c0_6] : memref<8x128xf32, #tpu.memory_space<vmem>>, vector<8x128xf32>
    %4 = vector.extract_strided_slice %3 {offsets = [0, 0], sizes = [1, 128], strides = [1, 1]} : vector<8x128xf32> to vector<1x128xf32>
    %5 = vector.extract_strided_slice %3 {offsets = [1, 0], sizes = [1, 128], strides = [1, 1]} : vector<8x128xf32> to vector<1x128xf32>
    %6 = vector.extract_strided_slice %3 {offsets = [2, 0], sizes = [1, 128], strides = [1, 1]} : vector<8x128xf32> to vector<1x128xf32>
    %7 = vector.extract_strided_slice %3 {offsets = [3, 0], sizes = [1, 128], strides = [1, 1]} : vector<8x128xf32> to vector<1x128xf32>
    %8 = vector.extract_strided_slice %3 {offsets = [4, 0], sizes = [1, 128], strides = [1, 1]} : vector<8x128xf32> to vector<1x128xf32>
    %9 = vector.extract_strided_slice %3 {offsets = [5, 0], sizes = [1, 128], strides = [1, 1]} : vector<8x128xf32> to vector<1x128xf32>
    %10 = vector.extract_strided_slice %3 {offsets = [6, 0], sizes = [1, 128], strides = [1, 1]} : vector<8x128xf32> to vector<1x128xf32>
    %11 = vector.extract_strided_slice %3 {offsets = [7, 0], sizes = [1, 128], strides = [1, 1]} : vector<8x128xf32> to vector<1x128xf32>
    %c0_7 = arith.constant 0 : index
    %c0_8 = arith.constant 0 : index
    %12 = vector.load %arg3[%c0_7, %c0_8] : memref<128x128xf32, #tpu.memory_space<vmem>>, vector<128x128xf32>
    %cst = arith.constant dense<0.000000e+00> : vector<2x8x128xf32>
    %13 = tpu.matmul %0, %12, %cst {dimension_numbers = #tpu.dot_dimension_numbers<[2], [0], [0, 1], [1], [0, 0, 0, 1, 1, 1], [], []>} : vector<2x8x128xf32>, vector<128x128xf32>, vector<2x8x128xf32> -> vector<2x8x128xf32>
    %14 = vector.shape_cast %4 : vector<1x128xf32> to vector<1x1x128xf32>
    %15 = vector.broadcast %14 : vector<1x1x128xf32> to vector<2x8x128xf32>
    %16 = arith.addf %13, %15 : vector<2x8x128xf32>
    %17 = vector.extract_strided_slice %16 {offsets = [0, 0, 0], sizes = [2, 8, 32], strides = [1, 1, 1]} : vector<2x8x128xf32> to vector<2x8x32xf32>
    %18 = vector.extract_strided_slice %16 {offsets = [0, 0, 32], sizes = [2, 8, 32], strides = [1, 1, 1]} : vector<2x8x128xf32> to vector<2x8x32xf32>
    %19 = vector.extract_strided_slice %16 {offsets = [0, 0, 64], sizes = [2, 8, 32], strides = [1, 1, 1]} : vector<2x8x128xf32> to vector<2x8x32xf32>
    %20 = vector.extract_strided_slice %17 {offsets = [0, 0, 0], sizes = [2, 8, 8], strides = [1, 1, 1]} : vector<2x8x32xf32> to vector<2x8x8xf32>
    %21 = vector.extract_strided_slice %18 {offsets = [0, 0, 0], sizes = [2, 8, 8], strides = [1, 1, 1]} : vector<2x8x32xf32> to vector<2x8x8xf32>
    %22 = vector.extract_strided_slice %19 {offsets = [0, 0, 0], sizes = [2, 8, 8], strides = [1, 1, 1]} : vector<2x8x32xf32> to vector<2x8x8xf32>
    %cst_9 = arith.constant dense<0.000000e+00> : vector<2x8x8xf32>
    %23 = tpu.matmul %20, %21, %cst_9 {dimension_numbers = #tpu.dot_dimension_numbers<[2], [2], [1], [1], [0, 0, 0, 1, 1, 1], [0], [0]>} : vector<2x8x8xf32>, vector<2x8x8xf32>, vector<2x8x8xf32> -> vector<2x8x8xf32>
    %24 = arith.addf %23, %2 : vector<2x8x8xf32>
    %cst_10 = arith.constant dense<0xFF800000> : vector<2x8xf32>
    %25 = vector.multi_reduction <maximumf>, %24, %cst_10 [2] : vector<2x8x8xf32> to vector<2x8xf32>
    %26 = vector.shape_cast %25 : vector<2x8xf32> to vector<2x8x1xf32>
    %27 = vector.broadcast %26 : vector<2x8x1xf32> to vector<2x8x8xf32>
    %28 = arith.subf %24, %27 : vector<2x8x8xf32>
    %29 = math.exp %28 : vector<2x8x8xf32>
    %cst_11 = arith.constant dense<0.000000e+00> : vector<2x8xf32>
    %30 = vector.multi_reduction <add>, %29, %cst_11 [2] : vector<2x8x8xf32> to vector<2x8xf32>
    %31 = vector.shape_cast %30 : vector<2x8xf32> to vector<2x8x1xf32>
    %32 = tpu.reciprocal %31 {approx = true} : vector<2x8x1xf32> -> vector<2x8x1xf32>
    %33 = vector.broadcast %32 : vector<2x8x1xf32> to vector<2x8x8xf32>
    %34 = arith.mulf %29, %33 : vector<2x8x8xf32>
    %cst_12 = arith.constant dense<0.000000e+00> : vector<2x8x8xf32>
    %35 = tpu.matmul %34, %22, %cst_12 {dimension_numbers = #tpu.dot_dimension_numbers<[2], [1], [1], [2], [0, 0, 0, 1, 1, 2], [0], [0]>} : vector<2x8x8xf32>, vector<2x8x8xf32>, vector<2x8x8xf32> -> vector<2x8x8xf32>
    %36 = vector.extract_strided_slice %17 {offsets = [0, 0, 8], sizes = [2, 8, 8], strides = [1, 1, 1]} : vector<2x8x32xf32> to vector<2x8x8xf32>
    %37 = vector.extract_strided_slice %18 {offsets = [0, 0, 8], sizes = [2, 8, 8], strides = [1, 1, 1]} : vector<2x8x32xf32> to vector<2x8x8xf32>
    %38 = vector.extract_strided_slice %19 {offsets = [0, 0, 8], sizes = [2, 8, 8], strides = [1, 1, 1]} : vector<2x8x32xf32> to vector<2x8x8xf32>
    %cst_13 = arith.constant dense<0.000000e+00> : vector<2x8x8xf32>
    %39 = tpu.matmul %36, %37, %cst_13 {dimension_numbers = #tpu.dot_dimension_numbers<[2], [2], [1], [1], [0, 0, 0, 1, 1, 1], [0], [0]>} : vector<2x8x8xf32>, vector<2x8x8xf32>, vector<2x8x8xf32> -> vector<2x8x8xf32>
    %40 = arith.addf %39, %2 : vector<2x8x8xf32>
    %cst_14 = arith.constant dense<0xFF800000> : vector<2x8xf32>
    %41 = vector.multi_reduction <maximumf>, %40, %cst_14 [2] : vector<2x8x8xf32> to vector<2x8xf32>
    %42 = vector.shape_cast %41 : vector<2x8xf32> to vector<2x8x1xf32>
    %43 = vector.broadcast %42 : vector<2x8x1xf32> to vector<2x8x8xf32>
    %44 = arith.subf %40, %43 : vector<2x8x8xf32>
    %45 = math.exp %44 : vector<2x8x8xf32>
    %cst_15 = arith.constant dense<0.000000e+00> : vector<2x8xf32>
    %46 = vector.multi_reduction <add>, %45, %cst_15 [2] : vector<2x8x8xf32> to vector<2x8xf32>
    %47 = vector.shape_cast %46 : vector<2x8xf32> to vector<2x8x1xf32>
    %48 = tpu.reciprocal %47 {approx = true} : vector<2x8x1xf32> -> vector<2x8x1xf32>
    %49 = vector.broadcast %48 : vector<2x8x1xf32> to vector<2x8x8xf32>
    %50 = arith.mulf %45, %49 : vector<2x8x8xf32>
    %cst_16 = arith.constant dense<0.000000e+00> : vector<2x8x8xf32>
    %51 = tpu.matmul %50, %38, %cst_16 {dimension_numbers = #tpu.dot_dimension_numbers<[2], [1], [1], [2], [0, 0, 0, 1, 1, 2], [0], [0]>} : vector<2x8x8xf32>, vector<2x8x8xf32>, vector<2x8x8xf32> -> vector<2x8x8xf32>
    %52 = vector.extract_strided_slice %17 {offsets = [0, 0, 16], sizes = [2, 8, 8], strides = [1, 1, 1]} : vector<2x8x32xf32> to vector<2x8x8xf32>
    %53 = vector.extract_strided_slice %18 {offsets = [0, 0, 16], sizes = [2, 8, 8], strides = [1, 1, 1]} : vector<2x8x32xf32> to vector<2x8x8xf32>
    %54 = vector.extract_strided_slice %19 {offsets = [0, 0, 16], sizes = [2, 8, 8], strides = [1, 1, 1]} : vector<2x8x32xf32> to vector<2x8x8xf32>
    %cst_17 = arith.constant dense<0.000000e+00> : vector<2x8x8xf32>
    %55 = tpu.matmul %52, %53, %cst_17 {dimension_numbers = #tpu.dot_dimension_numbers<[2], [2], [1], [1], [0, 0, 0, 1, 1, 1], [0], [0]>} : vector<2x8x8xf32>, vector<2x8x8xf32>, vector<2x8x8xf32> -> vector<2x8x8xf32>
    %56 = arith.addf %55, %2 : vector<2x8x8xf32>
    %cst_18 = arith.constant dense<0xFF800000> : vector<2x8xf32>
    %57 = vector.multi_reduction <maximumf>, %56, %cst_18 [2] : vector<2x8x8xf32> to vector<2x8xf32>
    %58 = vector.shape_cast %57 : vector<2x8xf32> to vector<2x8x1xf32>
    %59 = vector.broadcast %58 : vector<2x8x1xf32> to vector<2x8x8xf32>
    %60 = arith.subf %56, %59 : vector<2x8x8xf32>
    %61 = math.exp %60 : vector<2x8x8xf32>
    %cst_19 = arith.constant dense<0.000000e+00> : vector<2x8xf32>
    %62 = vector.multi_reduction <add>, %61, %cst_19 [2] : vector<2x8x8xf32> to vector<2x8xf32>
    %63 = vector.shape_cast %62 : vector<2x8xf32> to vector<2x8x1xf32>
    %64 = tpu.reciprocal %63 {approx = true} : vector<2x8x1xf32> -> vector<2x8x1xf32>
    %65 = vector.broadcast %64 : vector<2x8x1xf32> to vector<2x8x8xf32>
    %66 = arith.mulf %61, %65 : vector<2x8x8xf32>
    %cst_20 = arith.constant dense<0.000000e+00> : vector<2x8x8xf32>
    %67 = tpu.matmul %66, %54, %cst_20 {dimension_numbers = #tpu.dot_dimension_numbers<[2], [1], [1], [2], [0, 0, 0, 1, 1, 2], [0], [0]>} : vector<2x8x8xf32>, vector<2x8x8xf32>, vector<2x8x8xf32> -> vector<2x8x8xf32>
    %68 = vector.extract_strided_slice %17 {offsets = [0, 0, 24], sizes = [2, 8, 8], strides = [1, 1, 1]} : vector<2x8x32xf32> to vector<2x8x8xf32>
    %69 = vector.extract_strided_slice %18 {offsets = [0, 0, 24], sizes = [2, 8, 8], strides = [1, 1, 1]} : vector<2x8x32xf32> to vector<2x8x8xf32>
    %70 = vector.extract_strided_slice %19 {offsets = [0, 0, 24], sizes = [2, 8, 8], strides = [1, 1, 1]} : vector<2x8x32xf32> to vector<2x8x8xf32>
    %cst_21 = arith.constant dense<0.000000e+00> : vector<2x8x8xf32>
    %71 = tpu.matmul %68, %69, %cst_21 {dimension_numbers = #tpu.dot_dimension_numbers<[2], [2], [1], [1], [0, 0, 0, 1, 1, 1], [0], [0]>} : vector<2x8x8xf32>, vector<2x8x8xf32>, vector<2x8x8xf32> -> vector<2x8x8xf32>
    %72 = arith.addf %71, %2 : vector<2x8x8xf32>
    %cst_22 = arith.constant dense<0xFF800000> : vector<2x8xf32>
    %73 = vector.multi_reduction <maximumf>, %72, %cst_22 [2] : vector<2x8x8xf32> to vector<2x8xf32>
    %74 = vector.shape_cast %73 : vector<2x8xf32> to vector<2x8x1xf32>
    %75 = vector.broadcast %74 : vector<2x8x1xf32> to vector<2x8x8xf32>
    %76 = arith.subf %72, %75 : vector<2x8x8xf32>
    %77 = math.exp %76 : vector<2x8x8xf32>
    %cst_23 = arith.constant dense<0.000000e+00> : vector<2x8xf32>
    %78 = vector.multi_reduction <add>, %77, %cst_23 [2] : vector<2x8x8xf32> to vector<2x8xf32>
    %79 = vector.shape_cast %78 : vector<2x8xf32> to vector<2x8x1xf32>
    %80 = tpu.reciprocal %79 {approx = true} : vector<2x8x1xf32> -> vector<2x8x1xf32>
    %81 = vector.broadcast %80 : vector<2x8x1xf32> to vector<2x8x8xf32>
    %82 = arith.mulf %77, %81 : vector<2x8x8xf32>
    %cst_24 = arith.constant dense<0.000000e+00> : vector<2x8x8xf32>
    %83 = tpu.matmul %82, %70, %cst_24 {dimension_numbers = #tpu.dot_dimension_numbers<[2], [1], [1], [2], [0, 0, 0, 1, 1, 2], [0], [0]>} : vector<2x8x8xf32>, vector<2x8x8xf32>, vector<2x8x8xf32> -> vector<2x8x8xf32>
    %84 = tpu.concatenate %35, %51, %67, %83 in 2 : vector<2x8x8xf32>, vector<2x8x8xf32>, vector<2x8x8xf32>, vector<2x8x8xf32> -> vector<2x8x32xf32>
    %c0_25 = arith.constant 0 : index
    %c0_26 = arith.constant 0 : index
    %85 = vector.load %arg4[%c0_25, %c0_26] : memref<32x128xf32, #tpu.memory_space<vmem>>, vector<32x128xf32>
    %cst_27 = arith.constant dense<0.000000e+00> : vector<2x8x128xf32>
    %86 = tpu.matmul %84, %85, %cst_27 {dimension_numbers = #tpu.dot_dimension_numbers<[2], [0], [0, 1], [1], [0, 0, 0, 1, 1, 1], [], []>} : vector<2x8x32xf32>, vector<32x128xf32>, vector<2x8x128xf32> -> vector<2x8x128xf32>
    %87 = vector.shape_cast %5 : vector<1x128xf32> to vector<1x1x128xf32>
    %88 = vector.broadcast %87 : vector<1x1x128xf32> to vector<2x8x128xf32>
    %89 = arith.addf %86, %88 : vector<2x8x128xf32>
    %90 = arith.addf %0, %89 : vector<2x8x128xf32>
    %cst_28 = arith.constant dense<0.000000e+00> : vector<2x8xf32>
    %91 = vector.multi_reduction <add>, %90, %cst_28 [2] : vector<2x8x128xf32> to vector<2x8xf32>
    %92 = vector.shape_cast %91 : vector<2x8xf32> to vector<2x8x1xf32>
    %cst_29 = arith.constant 3.125000e-02 : f32
    %93 = vector.broadcast %cst_29 : f32 to vector<2x8x1xf32>
    %94 = arith.mulf %92, %93 : vector<2x8x1xf32>
    %95 = arith.mulf %90, %90 : vector<2x8x128xf32>
    %cst_30 = arith.constant dense<0.000000e+00> : vector<2x8xf32>
    %96 = vector.multi_reduction <add>, %95, %cst_30 [2] : vector<2x8x128xf32> to vector<2x8xf32>
    %97 = vector.shape_cast %96 : vector<2x8xf32> to vector<2x8x1xf32>
    %cst_31 = arith.constant 3.125000e-02 : f32
    %98 = vector.broadcast %cst_31 : f32 to vector<2x8x1xf32>
    %99 = arith.mulf %97, %98 : vector<2x8x1xf32>
    %100 = arith.mulf %94, %94 : vector<2x8x1xf32>
    %101 = arith.subf %99, %100 : vector<2x8x1xf32>
    %cst_32 = arith.constant 9.99999974E-6 : f32
    %102 = vector.broadcast %cst_32 : f32 to vector<2x8x1xf32>
    %103 = arith.addf %101, %102 : vector<2x8x1xf32>
    %104 = math.rsqrt %103 : vector<2x8x1xf32>
    %105 = vector.broadcast %94 : vector<2x8x1xf32> to vector<2x8x128xf32>
    %106 = arith.subf %90, %105 : vector<2x8x128xf32>
    %107 = vector.broadcast %104 : vector<2x8x1xf32> to vector<2x8x128xf32>
    %108 = arith.mulf %106, %107 : vector<2x8x128xf32>
    %109 = vector.shape_cast %6 : vector<1x128xf32> to vector<1x1x128xf32>
    %110 = vector.broadcast %109 : vector<1x1x128xf32> to vector<2x8x128xf32>
    %111 = arith.mulf %108, %110 : vector<2x8x128xf32>
    %112 = vector.shape_cast %7 : vector<1x128xf32> to vector<1x1x128xf32>
    %113 = vector.broadcast %112 : vector<1x1x128xf32> to vector<2x8x128xf32>
    %114 = arith.addf %111, %113 : vector<2x8x128xf32>
    %c0_33 = arith.constant 0 : index
    %c0_34 = arith.constant 0 : index
    %115 = vector.load %arg5[%c0_33, %c0_34] : memref<128x128xf32, #tpu.memory_space<vmem>>, vector<128x128xf32>
    %cst_35 = arith.constant dense<0.000000e+00> : vector<2x8x128xf32>
    %116 = tpu.matmul %114, %115, %cst_35 {dimension_numbers = #tpu.dot_dimension_numbers<[2], [0], [0, 1], [1], [0, 0, 0, 1, 1, 1], [], []>} : vector<2x8x128xf32>, vector<128x128xf32>, vector<2x8x128xf32> -> vector<2x8x128xf32>
    %117 = vector.shape_cast %8 : vector<1x128xf32> to vector<1x1x128xf32>
    %118 = vector.broadcast %117 : vector<1x1x128xf32> to vector<2x8x128xf32>
    %119 = arith.addf %116, %118 : vector<2x8x128xf32>
    %cst_36 = arith.constant 0.000000e+00 : f32
    %120 = vector.broadcast %cst_36 : f32 to vector<2x8x128xf32>
    %121 = arith.maximumf %119, %120 : vector<2x8x128xf32>
    %c0_37 = arith.constant 0 : index
    %c0_38 = arith.constant 0 : index
    %122 = vector.load %arg6[%c0_37, %c0_38] : memref<128x128xf32, #tpu.memory_space<vmem>>, vector<128x128xf32>
    %cst_39 = arith.constant dense<0.000000e+00> : vector<2x8x128xf32>
    %123 = tpu.matmul %121, %122, %cst_39 {dimension_numbers = #tpu.dot_dimension_numbers<[2], [0], [0, 1], [1], [0, 0, 0, 1, 1, 1], [], []>} : vector<2x8x128xf32>, vector<128x128xf32>, vector<2x8x128xf32> -> vector<2x8x128xf32>
    %124 = vector.shape_cast %9 : vector<1x128xf32> to vector<1x1x128xf32>
    %125 = vector.broadcast %124 : vector<1x1x128xf32> to vector<2x8x128xf32>
    %126 = arith.addf %123, %125 : vector<2x8x128xf32>
    %127 = arith.addf %114, %126 : vector<2x8x128xf32>
    %cst_40 = arith.constant dense<0.000000e+00> : vector<2x8xf32>
    %128 = vector.multi_reduction <add>, %127, %cst_40 [2] : vector<2x8x128xf32> to vector<2x8xf32>
    %129 = vector.shape_cast %128 : vector<2x8xf32> to vector<2x8x1xf32>
    %cst_41 = arith.constant 3.125000e-02 : f32
    %130 = vector.broadcast %cst_41 : f32 to vector<2x8x1xf32>
    %131 = arith.mulf %129, %130 : vector<2x8x1xf32>
    %132 = arith.mulf %127, %127 : vector<2x8x128xf32>
    %cst_42 = arith.constant dense<0.000000e+00> : vector<2x8xf32>
    %133 = vector.multi_reduction <add>, %132, %cst_42 [2] : vector<2x8x128xf32> to vector<2x8xf32>
    %134 = vector.shape_cast %133 : vector<2x8xf32> to vector<2x8x1xf32>
    %cst_43 = arith.constant 3.125000e-02 : f32
    %135 = vector.broadcast %cst_43 : f32 to vector<2x8x1xf32>
    %136 = arith.mulf %134, %135 : vector<2x8x1xf32>
    %137 = arith.mulf %131, %131 : vector<2x8x1xf32>
    %138 = arith.subf %136, %137 : vector<2x8x1xf32>
    %cst_44 = arith.constant 9.99999974E-6 : f32
    %139 = vector.broadcast %cst_44 : f32 to vector<2x8x1xf32>
    %140 = arith.addf %138, %139 : vector<2x8x1xf32>
    %141 = math.rsqrt %140 : vector<2x8x1xf32>
    %142 = vector.broadcast %131 : vector<2x8x1xf32> to vector<2x8x128xf32>
    %143 = arith.subf %127, %142 : vector<2x8x128xf32>
    %144 = vector.broadcast %141 : vector<2x8x1xf32> to vector<2x8x128xf32>
    %145 = arith.mulf %143, %144 : vector<2x8x128xf32>
    %146 = vector.shape_cast %10 : vector<1x128xf32> to vector<1x1x128xf32>
    %147 = vector.broadcast %146 : vector<1x1x128xf32> to vector<2x8x128xf32>
    %148 = arith.mulf %145, %147 : vector<2x8x128xf32>
    %149 = vector.shape_cast %11 : vector<1x128xf32> to vector<1x1x128xf32>
    %150 = vector.broadcast %149 : vector<1x1x128xf32> to vector<2x8x128xf32>
    %151 = arith.addf %148, %150 : vector<2x8x128xf32>
    %c0_45 = arith.constant 0 : index
    %c0_46 = arith.constant 0 : index
    %c0_47 = arith.constant 0 : index
    %152 = vector.load %arg8[%c0_45, %c0_46, %c0_47] : memref<2x8x128xf32, #tpu.memory_space<vmem>>, vector<2x8x128xf32>
    tpu.vector_store %arg8[%c0_45, %c0_46, %c0_47], %151 {strides = array<i32>} : memref<2x8x128xf32, #tpu.memory_space<vmem>>, vector<2x8x128xf32>,
    return
  }
  func.func @transform_0(%arg0: i32) -> (i32, i32, i32) {
    %c0_i32 = arith.constant 0 : i32
    %c0_i32_0 = arith.constant 0 : i32
    %c0_i32_1 = arith.constant 0 : i32
    %c0_i32_2 = arith.constant 0 : i32
    return %c0_i32, %c0_i32_0, %c0_i32_1 : i32, i32, i32
  }
  func.func @transform_1(%arg0: i32) -> (i32, i32, i32) {
    %c0_i32 = arith.constant 0 : i32
    %c0_i32_0 = arith.constant 0 : i32
    %c0_i32_1 = arith.constant 0 : i32
    %c0_i32_2 = arith.constant 0 : i32
    return %c0_i32, %c0_i32_0, %c0_i32_1 : i32, i32, i32
  }
  func.func @transform_2(%arg0: i32) -> (i32, i32) {
    %c0_i32 = arith.constant 0 : i32
    %c0_i32_0 = arith.constant 0 : i32
    %c0_i32_1 = arith.constant 0 : i32
    return %c0_i32, %c0_i32_0 : i32, i32
  }
  func.func @transform_3(%arg0: i32) -> (i32, i32) {
    %c0_i32 = arith.constant 0 : i32
    %c0_i32_0 = arith.constant 0 : i32
    %c0_i32_1 = arith.constant 0 : i32
    return %c0_i32, %c0_i32_0 : i32, i32
  }
  func.func @transform_4(%arg0: i32) -> (i32, i32) {
    %c0_i32 = arith.constant 0 : i32
    %c0_i32_0 = arith.constant 0 : i32
    %c0_i32_1 = arith.constant 0 : i32
    return %c0_i32, %c0_i32_0 : i32, i32
  }
  func.func @transform_5(%arg0: i32) -> (i32, i32) {
    %c0_i32 = arith.constant 0 : i32
    %c0_i32_0 = arith.constant 0 : i32
    %c0_i32_1 = arith.constant 0 : i32
    return %c0_i32, %c0_i32_0 : i32, i32
  }
  func.func @transform_6(%arg0: i32) -> (i32, i32) {
    %c0_i32 = arith.constant 0 : i32
    %c0_i32_0 = arith.constant 0 : i32
    %c0_i32_1 = arith.constant 0 : i32
    return %c0_i32, %c0_i32_0 : i32, i32
  }
  func.func @transform_7(%arg0: i32) -> (i32, i32, i32) {
    %c0_i32 = arith.constant 0 : i32
    %c0_i32_0 = arith.constant 0 : i32
    %c0_i32_1 = arith.constant 0 : i32
    %c0_i32_2 = arith.constant 0 : i32
    return %c0_i32, %c0_i32_0, %c0_i32_1 : i32, i32, i32
  }
}

</mosaic_0001>

<bundles_post_ra>
// kernel: tpu_custom_call.1
= control target key start
LH: loop header
LB: loop body
LE: loop exit
PB: predicated region body
PF: predicated region fallthrough
CT: control target
= control target key end

     0   :  { %12 = vsyncpa [#allocation3], 0  ;;  %s2765_s0 = inlined_call_operand.hbm [shape: f32[2,8,128], index: 0, kind: input, shape index: {}]   ;;  %s2766_s1 = inlined_call_operand.hbm [shape: f32[2,8,128], index: 1, kind: input, shape index: {}]   ;;  %s2767_s2 = inlined_call_operand.hbm [shape: f32[128,128], index: 2, kind: input, shape index: {}]   ;;  %s2768_s3 = inlined_call_operand.hbm [shape: f32[32,128], index: 3, kind: input, shape index: {}]   ;;  %s2769_s4 = inlined_call_operand.hbm [shape: f32[128,128], index: 4, kind: input, shape index: {}]   ;;  %s2770_s5 = inlined_call_operand.hbm [shape: f32[128,128], index: 5, kind: input, shape index: {}]   ;;  %s2771_s6 = inlined_call_operand.vmem [shape: f32[8,128], index: 6, kind: input, shape index: {}]   ;;  %s2772_s7 = inlined_call_operand.hbm [shape: f32[2,8,128], index: 7, kind: output, shape index: {}]  }
   0x1   :  { %13 = vsyncpa [#allocation6], 0 }
   0x2   :  { %14 = vsyncpa [#allocation9], 0 }
   0x3   :  { %15 = vsyncpa [#allocation12], 0 }
   0x4   :  { %16 = vsyncpa [#allocation4], 0  ;;  %s2472_s24 = smov [#allocation5]   ;;  %s2473_s26 = smov [#allocation8]  }
   0x5   :  { %s34_s25 = sshll.u32 %s2472_s24, 4  ;;  %s58_s27 = sshll.u32 %s2473_s26, 4  ;;  %s35_s25 = int_to_ptr.vmem [resolvable:$true] %s34_s25  ;;  %s59_s27 = int_to_ptr.vmem [resolvable:$true] %s58_s27 }
   0x6   :  { %s2330_s28 = scalar_lea.vmem %s35_s25, 256  ;;  %p2335_p1 = scmp.lt.s32.totalorder %s35_s25, %s35_s25 }
   0x7   :  { %p2331_p0 = scmp.ne.s32.totalorder %s35_s25, %s2330_s28  ;;  %p2336_p2 = scmp.lt.s32.totalorder %s2330_s28, %s2330_s28 }
   0x9   :  { %p2337_p3 = por %p2336_p2, %p2335_p1 }
   0xb   :  { %p2338_p4 = pnand %p2337_p3, %p2331_p0 }
   0xd   :  { %2341 = shalt.err (!%p2338_p4)
}
   0xe   :  { %s2474_s29 = smov 128   ;;  %s2475_s30 = smov 8  }
   0xf   :  { %40 = dma.hbm_to_vmem [thread:$0]  %s2766_s1, 256, %s35_s25, [#allocation6], %s2474_s29, %s2474_s29, %s2475_s30  }
  0x10   :  { %s2350_s10 = scalar_lea.vmem %s59_s27, 512  ;;  %p2355_p6 = scmp.lt.s32.totalorder %s59_s27, %s59_s27 }
  0x11   :  { %p2351_p5 = scmp.ne.s32.totalorder %s59_s27, %s2350_s10  ;;  %p2356_p7 = scmp.lt.s32.totalorder %s2350_s10, %s2350_s10 }
  0x13   :  { %p2357_p8 = por %p2356_p7, %p2355_p6 }
  0x15   :  { %p2358_p9 = pnand %p2357_p8, %p2351_p5 }
  0x17   :  { %2361 = shalt.err (!%p2358_p9)
}
  0x18   :  { %64 = dma.hbm_to_vmem [thread:$0]  %s2768_s3, 512, %s59_s27, [#allocation9], %s2474_s29, %s2474_s29, %s2475_s30  }
  0x19   :  { %s2476_s13 = smov [#allocation2]   ;;  %s2477_s15 = smov [#allocation7]  }
  0x1a   :  { %s22_s14 = sshll.u32 %s2476_s13, 4  ;;  %s46_s16 = sshll.u32 %s2477_s15, 4  ;;  %s23_s14 = int_to_ptr.vmem [resolvable:$true] %s22_s14  ;;  %s47_s16 = int_to_ptr.vmem [resolvable:$true] %s46_s16 }
  0x1b   :  { %s2370_s1 = scalar_lea.vmem %s23_s14, 256  ;;  %p2375_p11 = scmp.lt.s32.totalorder %s23_s14, %s23_s14 }
  0x1c   :  { %p2371_p10 = scmp.ne.s32.totalorder %s23_s14, %s2370_s1  ;;  %p2376_p12 = scmp.lt.s32.totalorder %s2370_s1, %s2370_s1 }
  0x1e   :  { %p2377_p13 = por %p2376_p12, %p2375_p11 }
  0x20   :  { %p2378_p0 = pnand %p2377_p13, %p2371_p10 }
  0x22   :  { %2381 = shalt.err (!%p2378_p0)
}
  0x23   :  { %28 = dma.hbm_to_vmem [thread:$0]  %s2765_s0, 256, %s23_s14, [#allocation3], %s2474_s29, %s2474_s29, %s2475_s30  }
  0x24   :  { %s2390_s3 = scalar_lea.vmem %s47_s16, 2048  ;;  %p2395_p2 = scmp.lt.s32.totalorder %s47_s16, %s47_s16 }
  0x25   :  { %p2391_p1 = scmp.ne.s32.totalorder %s47_s16, %s2390_s3  ;;  %p2396_p3 = scmp.lt.s32.totalorder %s2390_s3, %s2390_s3 }
  0x27   :  { %p2397_p4 = por %p2396_p3, %p2395_p2 }
  0x29   :  { %p2398_p5 = pnand %p2397_p4, %p2391_p1 }
  0x2b   :  { %2401 = shalt.err (!%p2398_p5)
}
  0x2c   :  { %52 = dma.hbm_to_vmem [thread:$0]  %s2767_s2, 2048, %s47_s16, [#allocation6], %s2474_s29, %s2474_s29, %s2475_s30  }
  0x2d   :  { %s2478_s21 = smov [#allocation10]   ;;  %s2479_s23 = smov [#allocation11]  }
  0x2e   :  { %s70_s22 = sshll.u32 %s2478_s21, 4  ;;  %s82_s24 = sshll.u32 %s2479_s23, 4  ;;  %s71_s22 = int_to_ptr.vmem [resolvable:$true] %s70_s22  ;;  %s83_s24 = int_to_ptr.vmem [resolvable:$true] %s82_s24 }
  0x2f   :  { %s2410_s0 = scalar_lea.vmem %s71_s22, 2048  ;;  %p2415_p7 = scmp.lt.s32.totalorder %s71_s22, %s71_s22 }
  0x30   :  { %p2411_p6 = scmp.ne.s32.totalorder %s71_s22, %s2410_s0  ;;  %p2416_p8 = scmp.lt.s32.totalorder %s2410_s0, %s2410_s0 }
  0x32   :  { %p2417_p9 = por %p2416_p8, %p2415_p7 }
  0x34   :  { %p2418_p10 = pnand %p2417_p9, %p2411_p6 }
  0x36   :  { %2421 = shalt.err (!%p2418_p10)
}
  0x37   :  { %76 = dma.hbm_to_vmem [thread:$0]  %s2769_s4, 2048, %s71_s22, [#allocation9], %s2474_s29, %s2474_s29, %s2475_s30  }
  0x38   :  { %s2430_s2 = scalar_lea.vmem %s83_s24, 2048  ;;  %p2435_p12 = scmp.lt.s32.totalorder %s83_s24, %s83_s24 }
  0x39   :  { %p2431_p11 = scmp.ne.s32.totalorder %s83_s24, %s2430_s2  ;;  %p2436_p13 = scmp.lt.s32.totalorder %s2430_s2, %s2430_s2 }
  0x3b   :  { %p2437_p0 = por %p2436_p13, %p2435_p12 }
  0x3d   :  { %p2438_p1 = pnand %p2437_p0, %p2431_p11 }
  0x3f   :  { %2441 = shalt.err (!%p2438_p1)
}
  0x40   :  { %88 = dma.hbm_to_vmem [thread:$0]  %s2770_s5, 2048, %s83_s24, [#allocation12], %s2474_s29, %s2474_s29, %s2475_s30  }
  0x41   :  { %2462 = dma.done.wait [#allocation3], 256  }
  0x42   :  { %2463 = vsyncadd [#allocation3], 4294967040 }
  0x43   :  { %2464 = dma.done.wait [#allocation6], 2304  }
  0x44   :  { %2465 = vsyncadd [#allocation6], 4294964992 }
  0x45   :  { %2466 = dma.done.wait [#allocation9], 2560  }
  0x46   :  { %2467 = vsyncadd [#allocation9], 4294964736 }
  0x47   :  { %2468 = dma.done.wait [#allocation12], 2048  }
  0x48   :  { %2469 = vsyncadd [#allocation12], 4294965248  ;;  %v129_v0 = vld [vmem:[#allocation7 + $0x78] sm:$0xff]  ;;  %v128_v1 = vld [vmem:[#allocation7 + $0x70] sm:$0xff]  ;;  %v2480_v18 = vmov 0.0   ;;  %v130_v19 = vlaneseq  ;;  %vm2481_vm0 = vmmov 0  }
  0x49   :  { %2062 = vmatprep.subr.mxu0 %v129_v0  ;;  %v127_v2 = vld [vmem:[#allocation7 + $0x68] sm:$0xff]  ;;  %v126_v3 = vld [vmem:[#allocation7 + $0x60] sm:$0xff]  ;;  %v125_v5 = vld [vmem:[#allocation7 + $0x58] sm:$0xff]  ;;  %2097 = vmatprep.subr.mxu1 %v2480_v18  ;;  %s2482_s8 = smov 96   ;;  %vm212_vm1 = vcmask 64512   ;;  %s2484_s9 = smov 88  }
  0x4a   :  { %2063 = vmatpush3.msra.mxu0 %v129_v0  ;;  %v2572_v4 = vld [vmem:[#allocation2] sm:$0xff]  ;;  %v124_v6 = vld [vmem:[#allocation7 + $0x50] sm:$0xff]  ;;  %v123_v7 = vld [vmem:[#allocation7 + $0x48] sm:$0xff]  ;;  %v2580_v20 = vshrl.u32 %v130_v19, 7  ;;  %2099 = vmatprep.mubr.msk.f32.mxu1 %vm2481_vm0, %v2480_v18  ;;  %s2485_s10 = smov 120   ;;  %s2486_s11 = smov 56  }
  0x4b   :  { %2064 = vmatprep.subr.mxu0 %v128_v1  ;;  %2094 = vmatprep.mubr.f32.mxu0 %v2572_v4  ;;  %v122_v8 = vld [vmem:[#allocation7 + $0x40] sm:$0xff]  ;;  %v121_v9 = vld [vmem:[#allocation7 + $0x38] sm:$0xff]  ;;  %v120_v10 = vld [vmem:[#allocation7 + $0x30] sm:$0xff]  ;;  %s2487_s12 = smov 80   ;;  %s2488_s13 = smov 112   ;;  %vm1557_vm2 = vcmask 195584  }
  0x4c   :  { %2065 = vmatpush3.msra.mxu0 %v128_v1  ;;  %v119_v11 = vld [vmem:[#allocation7 + $0x28] sm:$0xff]  ;;  %v118_v12 = vld [vmem:[#allocation7 + $0x20] sm:$0xff]  ;;  %v117_v13 = vld [vmem:[#allocation7 + $0x18] sm:$0xff]  ;;  %v132_v21 = vsub.s32 0, %v2580_v20  ;;  %s2489_s14 = smov 48   ;;  %s2490_s15 = smov 72  }
  0x4d   :  { %2066 = vmatprep.subr.mxu0 %v127_v2  ;;  %v116_v14 = vld [vmem:[#allocation7 + $0x10] sm:$0xff]  ;;  %v115_v15 = vld [vmem:[#allocation7 + $0x8] sm:$0xff]  ;;  %v114_v16 = vld [vmem:[#allocation7] sm:$0xff]  ;;  %s2491_s16 = smov 104   ;;  %s2492_s1 = smov 40   ;;  %vm1554_vm3 = vcmask 130048  }
  0x4e   :  { %2067 = vmatpush3.msra.mxu0 %v127_v2  ;;  %v2575_v17 = vld [vmem:[#allocation2 + $0x8] sm:$0xff]  ;;  %v2590_v22 = vld [vmem:[%s2771_s6] sm:$0xff]  ;;  %v2611_v30 = vld [vmem:[#allocation5] sm:$0xff]  ;;  %s2483_s6 = smov 64   ;;  %s2493_s17 = smov 16   ;;  %vm1568_vm4 = vcmask 261120  }
  0x4f   :  { %2068 = vmatprep.subr.mxu0 %v126_v3  ;;  %v133_v24 = vrot.slane %v2590_v22, %v132_v21  ;;  %v2614_v34 = vld [vmem:[#allocation5 + $0x8] sm:$0xff]  ;;  %s2494_s18 = smov 24   ;;  %s2495_s3 = smov [#allocation13]  }
  0x50   :  { %2069 = vmatpush3.msra.mxu0 %v126_v3  ;;  %s1929_s19 = sshll.u32 %s2495_s3, 4  ;;  %s1930_s19 = int_to_ptr.vmem [resolvable:$true] %s1929_s19 }
  0x51   :  { %2070 = vmatprep.subr.mxu0 %v125_v5  ;;  %s2442_s20 = scalar_lea.vmem %s1930_s19, 256  ;;  %p2447_p3 = scmp.lt.s32.totalorder %s1930_s19, %s1930_s19 }
  0x52   :  { %2071 = vmatpush3.msra.mxu0 %v125_v5  ;;  %p2443_p2 = scmp.ne.s32.totalorder %s1930_s19, %s2442_s20  ;;  %p2448_p4 = scmp.lt.s32.totalorder %s2442_s20, %s2442_s20 }
  0x53   :  { %2072 = vmatprep.subr.mxu0 %v124_v6 }
  0x54   :  { %2073 = vmatpush3.msra.mxu0 %v124_v6  ;;  %p2449_p5 = por %p2448_p4, %p2447_p3 }
  0x55   :  { %2074 = vmatprep.subr.mxu0 %v123_v7 }
  0x56   :  { %2075 = vmatpush3.msra.mxu0 %v123_v7  ;;  %p2450_p6 = pnand %p2449_p5, %p2443_p2 }
  0x57   :  { %2076 = vmatprep.subr.mxu0 %v122_v8 }
  0x58   :  { %2077 = vmatpush3.msra.mxu0 %v122_v8 }
  0x59   :  { %2078 = vmatprep.subr.mxu0 %v121_v9 }
  0x5a   :  { %2079 = vmatpush3.msra.mxu0 %v121_v9 }
  0x5b   :  { %2080 = vmatprep.subr.mxu0 %v120_v10 }
  0x5c   :  { %2081 = vmatpush3.msra.mxu0 %v120_v10 }
  0x5d   :  { %2082 = vmatprep.subr.mxu0 %v119_v11 }
  0x5e   :  { %2083 = vmatpush3.msra.mxu0 %v119_v11 }
  0x5f   :  { %2084 = vmatprep.subr.mxu0 %v118_v12 }
  0x60   :  { %2085 = vmatpush3.msra.mxu0 %v118_v12 }
  0x61   :  { %2086 = vmatprep.subr.mxu0 %v117_v13 }
  0x62   :  { %2087 = vmatpush3.msra.mxu0 %v117_v13 }
  0x63   :  { %2088 = vmatprep.subr.mxu0 %v116_v14 }
  0x64   :  { %2089 = vmatpush3.msra.mxu0 %v116_v14 }
  0x65   :  { %2090 = vmatprep.subr.mxu0 %v115_v15 }
  0x66   :  { %2091 = vmatpush3.msra.mxu0 %v115_v15 }
  0x67   :  { %2092 = vmatprep.subr.mxu0 %v114_v16 }
  0x68   :  { %2093 = vmatpush3.msra.mxu0 %v114_v16 }
  0x69   :  { %2095 = vmatmul.mubr.f32.vlgmr.msra.gmra.mxu0 %v2575_v17  ;;  %2147 = vmatprep.subr.mxu0 %v2480_v18 }
  0x6a   :  { %2149 = vmatprep.mubr.msk.f32.mxu0 %vm2481_vm0, %v2480_v18 }
 0x129   :  { %v2096_v23 = vpop.f32.mrf.mxu0 }
 0x12a   :  { %v2596_v27 = vadd.f32 %v2096_v23, %v133_v24 }
 0x12b   :  { %v200_v25 = vpop.f32.mrf.mxu0 }
 0x12c   :  { %v2593_v26 = vadd.f32 %v200_v25, %v133_v24 }
 0x12e   :  { %210 = vrot.lane.b32.xlu0 %v2593_v26, %s2482_s8 }
 0x132   :  { %288 = vrot.lane.b32.xlu0 %v2596_v27, %s2482_s8 }
 0x1a0   :  { %v211_v28 = vpop.permute.xlu0 %210 }
 0x1a1   :  { %2098 = vmatpush3.xpose.msk.msra.mxu1 %vm212_vm1, %v211_v28 }
 0x1a2   :  { %2102 = vmatprep.subr.mxu1 %v2480_v18 }
 0x1a4   :  { %2100 = vmatmul.mubr.msk.f32.vlgmr.msra.gmra.mxu1 %vm212_vm1, %v2593_v26  ;;  %v289_v29 = vpop.permute.xlu0 %288 }
 0x1a5   :  { %2103 = vmatpush3.xpose.msk.msra.mxu1 %vm212_vm1, %v289_v29  ;;  %2104 = vmatprep.mubr.msk.f32.mxu1 %vm2481_vm0, %v2480_v18 }
 0x1a6   :  { %2107 = vmatprep.subr.mxu1 %v2480_v18 }
 0x1a8   :  { %2105 = vmatmul.mubr.msk.f32.vlgmr.msra.gmra.mxu1 %vm212_vm1, %v2596_v27 }
 0x1a9   :  { %2109 = vmatprep.mubr.msk.f32.mxu1 %vm2481_vm0, %v2480_v18 }
 0x264   :  { %v283_v31 = vpop.f32.mrf.mxu1 }
 0x265   :  { %v284_v32 = vadd.f32 %v283_v31, %v2611_v30 }
 0x266   :  { %v2101_v33 = vpop.f32.mrf.mxu1 }
 0x267   :  { %v364_v35 = vsel %vm212_vm1, %v284_v32, -inf }
 0x268   :  { %365 = vmax.xlane.f32.xlu1 %v364_v35  ;;  %v360_v36 = vpop.f32.mrf.mxu1 }
 0x269   :  { %v361_v37 = vadd.f32 %v360_v36, %v2614_v34 }
 0x26a   :  { %v2106_v38 = vpop.f32.mrf.mxu1 }
 0x26b   :  { %v367_v39 = vsel %vm212_vm1, %v361_v37, -inf }
 0x26c   :  { %368 = vmax.xlane.f32.xlu1 %v367_v39 }
 0x27d   :  { %386 = vrot.lane.b32.xlu1 %v2593_v26, %s2483_s6 }
 0x281   :  { %462 = vrot.lane.b32.xlu1 %v2596_v27, %s2483_s6 }
 0x285   :  { %540 = vrot.lane.b32.xlu1 %v2593_v26, %s2484_s9 }
 0x289   :  { %538 = vrot.lane.b32.xlu1 %v2593_v26, %s2485_s10 }
 0x2f1   :  { %v366_v40 = vpop.xlane.xlu1 %365 }
 0x2f2   :  { %v370_v41 = vsub.f32 %v284_v32, %v366_v40 }
 0x2f4   :  { %v372_v42 = vmul.f32 1.442695, %v370_v41 }
 0x2f5   :  { %v369_v43 = vpop.xlane.xlu1 %368 }
 0x2f6   :  { %2282 = vpow2.f32 %v372_v42  ;;  %v371_v44 = vsub.f32 %v361_v37, %v369_v43 }
 0x2f8   :  { %v374_v45 = vmul.f32 1.442695, %v371_v44 }
 0x2f9   :  { %v387_v46 = vpop.permute.xlu1 %386 }
 0x2fa   :  { %2284 = vpow2.f32 %v374_v45  ;;  %2108 = vmatpush3.msra.mxu1 %v387_v46 }
 0x2fb   :  { %2112 = vmatprep.subr.mxu1 %v2480_v18 }
 0x2fd   :  { %v463_v51 = vpop.permute.xlu1 %462 }
 0x301   :  { %v541_v52 = vpop.permute.xlu1 %540 }
 0x303   :  { %v2283_v47 = vpop.eup %2282 }
 0x304   :  { %v376_v48 = vsel %vm212_vm1, %v2283_v47, 0.0 }
 0x305   :  { %377 = vadd.xlane.f32.xlu0 %v376_v48  ;;  %v539_v53 = vpop.permute.xlu1 %538 }
 0x307   :  { %v2285_v49 = vpop.eup %2284 }
 0x308   :  { %v379_v50 = vsel %vm212_vm1, %v2285_v49, 0.0 }
 0x309   :  { %380 = vadd.xlane.f32.xlu1 %v379_v50 }
 0x31a   :  { %616 = vrot.lane.b32.xlu1 %v2596_v27, %s2485_s10 }
 0x31b   :  { %618 = vrot.lane.b32.xlu0 %v2596_v27, %s2484_s9 }
 0x38e   :  { %v378_v54 = vpop.xlane.xlu0 %377 }
 0x38f   :  { %2286 = vrcp.f32 %v378_v54 }
 0x392   :  { %v381_v55 = vpop.xlane.xlu1 %380  ;;  %v619_v60 = vpop.permute.xlu0 %618 }
 0x393   :  { %2288 = vrcp.f32 %v381_v55 }
 0x396   :  { %v617_v61 = vpop.permute.xlu1 %616 }
 0x39c   :  { %v2287_v56 = vpop.eup %2286 }
 0x39d   :  { %v384_v57 = vmul.f32 %v2287_v56, %v2283_v47 }
 0x39f   :  { %2110 = vmatmul.mubr.msk.f32.vlgmr.msra.gmra.mxu1 %vm212_vm1, %v384_v57 }
 0x3a0   :  { %v2289_v58 = vpop.eup %2288  ;;  %2113 = vmatpush3.msra.mxu1 %v463_v51  ;;  %2114 = vmatprep.mubr.msk.f32.mxu1 %vm2481_vm0, %v2480_v18 }
 0x3a1   :  { %2117 = vmatprep.subr.mxu1 %v2480_v18  ;;  %v385_v59 = vmul.f32 %v2289_v58, %v2285_v49 }
 0x3a3   :  { %2115 = vmatmul.mubr.msk.f32.vlgmr.msra.gmra.mxu1 %vm212_vm1, %v385_v59 }
 0x3a4   :  { %2118 = vmatpush3.xpose.msk.msra.mxu1 %vm212_vm1, %v541_v52  ;;  %2119 = vmatprep.mubr.msk.f32.mxu1 %vm2481_vm0, %v2480_v18 }
 0x3a5   :  { %2122 = vmatprep.subr.mxu1 %v2480_v18 }
 0x3a7   :  { %2120 = vmatmul.mubr.msk.f32.vlgmr.msra.gmra.mxu1 %vm212_vm1, %v539_v53 }
 0x3a8   :  { %2123 = vmatpush3.xpose.msk.msra.mxu1 %vm212_vm1, %v619_v60  ;;  %2124 = vmatprep.mubr.msk.f32.mxu1 %vm2481_vm0, %v2480_v18 }
 0x3a9   :  { %2127 = vmatprep.subr.mxu1 %v2480_v18 }
 0x3ab   :  { %2125 = vmatmul.mubr.msk.f32.vlgmr.msra.gmra.mxu1 %vm212_vm1, %v617_v61 }
 0x3ac   :  { %2129 = vmatprep.mubr.msk.f32.mxu1 %vm2481_vm0, %v2480_v18 }
 0x45f   :  { %v2645_v62 = vpop.f32.mrf.mxu1 }
 0x461   :  { %v2111_v63 = vpop.f32.mrf.mxu1 }
 0x463   :  { %v2647_v0 = vpop.f32.mrf.mxu1 }
 0x465   :  { %v2116_v1 = vpop.f32.mrf.mxu1 }
 0x467   :  { %v612_v2 = vpop.f32.mrf.mxu1 }
 0x468   :  { %v613_v3 = vadd.f32 %v612_v2, %v2611_v30 }
 0x469   :  { %v2121_v5 = vpop.f32.mrf.mxu1 }
 0x46a   :  { %v694_v6 = vsel %vm212_vm1, %v613_v3, -inf }
 0x46b   :  { %695 = vmax.xlane.f32.xlu1 %v694_v6  ;;  %v690_v7 = vpop.f32.mrf.mxu1 }
 0x46c   :  { %v691_v8 = vadd.f32 %v690_v7, %v2614_v34 }
 0x46d   :  { %v2126_v9 = vpop.f32.mrf.mxu1 }
 0x46e   :  { %v697_v10 = vsel %vm212_vm1, %v691_v8, -inf }
 0x46f   :  { %698 = vmax.xlane.f32.xlu0 %v697_v10 }
 0x47c   :  { %716 = vrot.lane.b32.xlu1 %v2593_v26, %s2486_s11 }
 0x480   :  { %870 = vrot.lane.b32.xlu1 %v2593_v26, %s2487_s12 }
 0x484   :  { %868 = vrot.lane.b32.xlu1 %v2593_v26, %s2488_s13 }
 0x485   :  { %792 = vrot.lane.b32.xlu0 %v2596_v27, %s2486_s11 }
 0x489   :  { %948 = vrot.lane.b32.xlu0 %v2596_v27, %s2487_s12 }
 0x4f4   :  { %v696_v11 = vpop.xlane.xlu1 %695 }
 0x4f5   :  { %v700_v12 = vsub.f32 %v613_v3, %v696_v11 }
 0x4f7   :  { %v702_v13 = vmul.f32 1.442695, %v700_v12 }
 0x4f8   :  { %v717_v14 = vpop.permute.xlu1 %716  ;;  %v699_v15 = vpop.xlane.xlu0 %698 }
 0x4f9   :  { %2290 = vpow2.f32 %v702_v13  ;;  %v701_v16 = vsub.f32 %v691_v8, %v699_v15  ;;  %2128 = vmatpush3.msra.mxu1 %v717_v14 }
 0x4fa   :  { %2132 = vmatprep.subr.mxu1 %v2480_v18 }
 0x4fb   :  { %v704_v19 = vmul.f32 1.442695, %v701_v16 }
 0x4fc   :  { %v871_v28 = vpop.permute.xlu1 %870  ;;  %v793_v36 = vpop.permute.xlu0 %792 }
 0x4fd   :  { %2292 = vpow2.f32 %v704_v19 }
 0x500   :  { %v869_v29 = vpop.permute.xlu1 %868  ;;  %v949_v39 = vpop.permute.xlu0 %948 }
 0x506   :  { %v2291_v21 = vpop.eup %2290 }
 0x507   :  { %v706_v23 = vsel %vm212_vm1, %v2291_v21, 0.0 }
 0x508   :  { %707 = vadd.xlane.f32.xlu1 %v706_v23 }
 0x50a   :  { %v2293_v24 = vpop.eup %2292 }
 0x50b   :  { %v709_v25 = vsel %vm212_vm1, %v2293_v24, 0.0 }
 0x50c   :  { %710 = vadd.xlane.f32.xlu1 %v709_v25 }
 0x51d   :  { %946 = vrot.lane.b32.xlu1 %v2596_v27, %s2488_s13 }
 0x591   :  { %v708_v31 = vpop.xlane.xlu1 %707 }
 0x592   :  { %2294 = vrcp.f32 %v708_v31 }
 0x595   :  { %v711_v32 = vpop.xlane.xlu1 %710 }
 0x596   :  { %2296 = vrcp.f32 %v711_v32 }
 0x599   :  { %v947_v40 = vpop.permute.xlu1 %946 }
 0x59f   :  { %v2295_v33 = vpop.eup %2294 }
 0x5a0   :  { %v714_v35 = vmul.f32 %v2295_v33, %v2291_v21 }
 0x5a2   :  { %2130 = vmatmul.mubr.msk.f32.vlgmr.msra.gmra.mxu1 %vm212_vm1, %v714_v35 }
 0x5a3   :  { %v2297_v37 = vpop.eup %2296  ;;  %2133 = vmatpush3.msra.mxu1 %v793_v36  ;;  %2134 = vmatprep.mubr.msk.f32.mxu1 %vm2481_vm0, %v2480_v18 }
 0x5a4   :  { %2137 = vmatprep.subr.mxu1 %v2480_v18  ;;  %v715_v38 = vmul.f32 %v2297_v37, %v2293_v24 }
 0x5a6   :  { %2135 = vmatmul.mubr.msk.f32.vlgmr.msra.gmra.mxu1 %vm212_vm1, %v715_v38 }
 0x5a7   :  { %2138 = vmatpush3.xpose.msk.msra.mxu1 %vm212_vm1, %v871_v28  ;;  %2139 = vmatprep.mubr.msk.f32.mxu1 %vm2481_vm0, %v2480_v18 }
 0x5a8   :  { %2142 = vmatprep.subr.mxu1 %v2480_v18 }
 0x5aa   :  { %2140 = vmatmul.mubr.msk.f32.vlgmr.msra.gmra.mxu1 %vm212_vm1, %v869_v29 }
 0x5ab   :  { %2143 = vmatpush3.xpose.msk.msra.mxu1 %vm212_vm1, %v949_v39  ;;  %2144 = vmatprep.mubr.msk.f32.mxu1 %vm2481_vm0, %v2480_v18 }
 0x5ac   :  { %2152 = vmatprep.subr.mxu1 %v2480_v18 }
 0x5ae   :  { %2145 = vmatmul.mubr.msk.f32.vlgmr.msra.gmra.mxu1 %vm212_vm1, %v947_v40 }
 0x5af   :  { %2154 = vmatprep.mubr.msk.f32.mxu1 %vm2481_vm0, %v2480_v18 }
 0x662   :  { %v2679_v41 = vpop.f32.mrf.mxu1 }
 0x664   :  { %v2131_v42 = vpop.f32.mrf.mxu1 }
 0x666   :  { %v2681_v43 = vpop.f32.mrf.mxu1 }
 0x668   :  { %v2136_v44 = vpop.f32.mrf.mxu1 }
 0x66a   :  { %v942_v45 = vpop.f32.mrf.mxu1 }
 0x66b   :  { %v943_v46 = vadd.f32 %v942_v45, %v2611_v30 }
 0x66c   :  { %v2141_v47 = vpop.f32.mrf.mxu1 }
 0x66d   :  { %v1024_v48 = vsel %vm212_vm1, %v943_v46, -inf }
 0x66e   :  { %1025 = vmax.xlane.f32.xlu0 %v1024_v48  ;;  %v1020_v49 = vpop.f32.mrf.mxu1  ;;  %v1563_v48 = vld [vmem:[#allocation8 + $0x18] sm:$0xff] }
 0x66f   :  { %v1021_v50 = vadd.f32 %v1020_v49, %v2614_v34  ;;  %v1562_v49 = vld [vmem:[#allocation8 + $0x10] sm:$0xff] }
 0x670   :  { %v2146_v51 = vpop.f32.mrf.mxu1 }
 0x671   :  { %v1027_v52 = vsel %vm212_vm1, %v1021_v50, -inf }
 0x672   :  { %1028 = vmax.xlane.f32.xlu1 %v1027_v52 }
 0x683   :  { %1046 = vrot.lane.b32.xlu1 %v2593_v26, %s2489_s14 }
 0x684   :  { %1122 = vrot.lane.b32.xlu0 %v2596_v27, %s2489_s14 }
 0x687   :  { %1200 = vrot.lane.b32.xlu1 %v2593_v26, %s2490_s15 }
 0x68b   :  { %1278 = vrot.lane.b32.xlu1 %v2596_v27, %s2490_s15 }
 0x68f   :  { %1276 = vrot.lane.b32.xlu1 %v2596_v27, %s2491_s16 }
 0x6f7   :  { %v1026_v53 = vpop.xlane.xlu0 %1025 }
 0x6f8   :  { %v1030_v54 = vsub.f32 %v943_v46, %v1026_v53 }
 0x6fa   :  { %v1032_v55 = vmul.f32 1.442695, %v1030_v54 }
 0x6fb   :  { %v1123_v56 = vpop.permute.xlu0 %1122  ;;  %v1029_v57 = vpop.xlane.xlu1 %1028 }
 0x6fc   :  { %2298 = vpow2.f32 %v1032_v55  ;;  %v1031_v58 = vsub.f32 %v1021_v50, %v1029_v57  ;;  %2153 = vmatpush3.msra.mxu1 %v1123_v56  ;;  %v1560_v50 = vld [vmem:[#allocation8] sm:$0xff] }
 0x6fd   :  { %2162 = vmatprep.subr.mxu1 %v2480_v18 }
 0x6fe   :  { %v1034_v59 = vmul.f32 1.442695, %v1031_v58 }
 0x6ff   :  { %v1047_v60 = vpop.permute.xlu1 %1046 }
 0x700   :  { %2300 = vpow2.f32 %v1034_v59  ;;  %2148 = vmatpush3.msra.mxu0 %v1047_v60 }
 0x701   :  { %2157 = vmatprep.subr.mxu0 %v2480_v18 }
 0x703   :  { %v1201_v6 = vpop.permute.xlu1 %1200 }
 0x707   :  { %v1279_v10 = vpop.permute.xlu1 %1278 }
 0x709   :  { %v2299_v61 = vpop.eup %2298 }
 0x70a   :  { %v1036_v63 = vsel %vm212_vm1, %v2299_v61, 0.0 }
 0x70b   :  { %1037 = vadd.xlane.f32.xlu0 %v1036_v63  ;;  %v1277_v13 = vpop.permute.xlu1 %1276 }
 0x70d   :  { %v2301_v1 = vpop.eup %2300 }
 0x70e   :  { %v1039_v2 = vsel %vm212_vm1, %v2301_v1, 0.0 }
 0x70f   :  { %1040 = vadd.xlane.f32.xlu0 %v1039_v2 }
 0x725   :  { %1198 = vrot.lane.b32.xlu0 %v2593_v26, %s2491_s16 }
 0x794   :  { %v1038_v3 = vpop.xlane.xlu0 %1037 }
 0x795   :  { %2302 = vrcp.f32 %v1038_v3 }
 0x798   :  { %v1041_v5 = vpop.xlane.xlu0 %1040 }
 0x799   :  { %2304 = vrcp.f32 %v1041_v5 }
 0x79c   :  { %v1199_v12 = vpop.permute.xlu0 %1198 }
 0x7a2   :  { %v2303_v7 = vpop.eup %2302 }
 0x7a3   :  { %v1044_v8 = vmul.f32 %v2303_v7, %v2299_v61 }
 0x7a5   :  { %2150 = vmatmul.mubr.msk.f32.vlgmr.msra.gmra.mxu0 %vm212_vm1, %v1044_v8 }
 0x7a6   :  { %v2305_v9 = vpop.eup %2304  ;;  %2158 = vmatpush3.xpose.msk.msra.mxu0 %vm212_vm1, %v1201_v6  ;;  %2159 = vmatprep.mubr.msk.f32.mxu0 %vm2481_vm0, %v2480_v18  ;;  %v1566_v6 = vsub.s32 1, %v2580_v20 }
 0x7a7   :  { %v1045_v11 = vmul.f32 %v2305_v9, %v2301_v1  ;;  %2167 = vmatprep.subr.mxu0 %v2480_v18 }
 0x7a8   :  { %v1567_v7 = vrot.slane %v2590_v22, %v1566_v6 }
 0x7a9   :  { %2155 = vmatmul.mubr.msk.f32.vlgmr.msra.gmra.mxu1 %vm212_vm1, %v1045_v11  ;;  %2160 = vmatmul.mubr.msk.f32.vlgmr.msra.gmra.mxu0 %vm212_vm1, %v1199_v12 }
 0x7aa   :  { %2163 = vmatpush3.xpose.msk.msra.mxu1 %vm212_vm1, %v1279_v10  ;;  %2164 = vmatprep.mubr.msk.f32.mxu1 %vm2481_vm0, %v2480_v18 }
 0x7ab   :  { %2172 = vmatprep.subr.mxu1 %v2480_v18  ;;  %2169 = vmatprep.mubr.msk.f32.mxu0 %vm2481_vm0, %v2480_v18 }
 0x7ad   :  { %2165 = vmatmul.mubr.msk.f32.vlgmr.msra.gmra.mxu1 %vm212_vm1, %v1277_v13 }
 0x7ae   :  { %2174 = vmatprep.mubr.msk.f32.mxu1 %vm2481_vm0, %v2480_v18 }
 0x865   :  { %v1118_v14 = vpop.f32.mrf.mxu0 }
 0x867   :  { %v2151_v15 = vpop.f32.mrf.mxu0 }
 0x868   :  { %v1702_v15 = vld [vmem:[#allocation10 + $0x60] sm:$0xff] }
 0x869   :  { %v1194_v16 = vpop.f32.mrf.mxu1  ;;  %v1272_v19 = vpop.f32.mrf.mxu0 }
 0x86a   :  { %v1273_v21 = vadd.f32 %v1272_v19, %v2611_v30  ;;  %v1700_v19 = vld [vmem:[#allocation10 + $0x50] sm:$0xff] }
 0x86b   :  { %v2156_v23 = vpop.f32.mrf.mxu1  ;;  %v2161_v24 = vpop.f32.mrf.mxu0 }
 0x86c   :  { %v1354_v25 = vsel %vm212_vm1, %v1273_v21, -inf  ;;  %v1698_v23 = vld [vmem:[#allocation10 + $0x40] sm:$0xff]  ;;  %v1697_v24 = vld [vmem:[#allocation10 + $0x38] sm:$0xff] }
 0x86d   :  { %1355 = vmax.xlane.f32.xlu0 %v1354_v25  ;;  %v1350_v28 = vpop.f32.mrf.mxu1  ;;  %v1696_v25 = vld [vmem:[#allocation10 + $0x30] sm:$0xff] }
 0x86e   :  { %v1351_v29 = vadd.f32 %v1350_v28, %v2614_v34  ;;  %v1695_v28 = vld [vmem:[#allocation10 + $0x28] sm:$0xff] }
 0x86f   :  { %v2166_v31 = vpop.f32.mrf.mxu1 }
 0x870   :  { %v1357_v32 = vsel %vm212_vm1, %v1351_v29, -inf  ;;  %v1693_v31 = vld [vmem:[#allocation10 + $0x18] sm:$0xff] }
 0x871   :  { %1358 = vmax.xlane.f32.xlu1 %v1357_v32  ;;  %v1692_v32 = vld [vmem:[#allocation10 + $0x10] sm:$0xff] }
 0x882   :  { %1376 = vrot.lane.b32.xlu1 %v2593_v26, %s2492_s1 }
 0x886   :  { %1530 = vrot.lane.b32.xlu1 %v2679_v41, %s2475_s30 }
 0x88a   :  { %1532 = vrot.lane.b32.xlu1 %v2681_v43, %s2475_s30 }
 0x88e   :  { %1540 = vrot.lane.b32.xlu1 %v1194_v16, %s2493_s17  ;;  %v1701_v16 = vld [vmem:[#allocation10 + $0x58] sm:$0xff] }
 0x8f6   :  { %v1356_v18 = vpop.xlane.xlu0 %1355 }
 0x8f7   :  { %v1360_v30 = vsub.f32 %v1273_v21, %v1356_v18  ;;  %v1699_v21 = vld [vmem:[#allocation10 + $0x48] sm:$0xff] }
 0x8f8   :  { %v1691_v18 = vld [vmem:[#allocation10 + $0x8] sm:$0xff] }
 0x8f9   :  { %v1362_v33 = vmul.f32 1.442695, %v1360_v30  ;;  %v1690_v30 = vld [vmem:[#allocation10] sm:$0xff] }
 0x8fa   :  { %v1359_v35 = vpop.xlane.xlu1 %1358 }
 0x8fb   :  { %2306 = vpow2.f32 %v1362_v33  ;;  %v1361_v34 = vsub.f32 %v1351_v29, %v1359_v35  ;;  %v1694_v29 = vld [vmem:[#allocation10 + $0x20] sm:$0xff]  ;;  %v1802_v33 = vld [vmem:[#allocation11 + $0x78] sm:$0xff]  ;;  %v1801_v35 = vld [vmem:[#allocation11 + $0x70] sm:$0xff] }
 0x8fd   :  { %v1364_v36 = vmul.f32 1.442695, %v1361_v34  ;;  %v1800_v34 = vld [vmem:[#allocation11 + $0x68] sm:$0xff] }
 0x8fe   :  { %v1377_v37 = vpop.permute.xlu1 %1376 }
 0x8ff   :  { %2308 = vpow2.f32 %v1364_v36  ;;  %2168 = vmatpush3.msra.mxu0 %v1377_v37  ;;  %v1799_v36 = vld [vmem:[#allocation11 + $0x60] sm:$0xff]  ;;  %v1798_v37 = vld [vmem:[#allocation11 + $0x58] sm:$0xff] }
 0x900   :  { %2177 = vmatprep.subr.mxu0 %v1563_v48 }
 0x902   :  { %v1531_v55 = vpop.permute.xlu1 %1530 }
 0x903   :  { %v1552_v58 = vsel %vm212_vm1, %v2645_v62, %v1531_v55 }
 0x906   :  { %v1533_v56 = vpop.permute.xlu1 %1532 }
 0x907   :  { %v1553_v1 = vsel %vm212_vm1, %v2647_v0, %v1533_v56 }
 0x908   :  { %v2307_v38 = vpop.eup %2306 }
 0x909   :  { %v1366_v26 = vsel %vm212_vm1, %v2307_v38, 0.0 }
 0x90a   :  { %1367 = vadd.xlane.f32.xlu0 %v1366_v26  ;;  %v1541_v59 = vpop.permute.xlu1 %1540  ;;  %v1796_v26 = vld [vmem:[#allocation11 + $0x48] sm:$0xff] }
 0x90b   :  { %v1556_v2 = vsel %vm1554_vm3, %v1553_v1, %v1541_v59 }
 0x90c   :  { %v2309_v39 = vpop.eup %2308 }
 0x90d   :  { %v1369_v40 = vsel %vm212_vm1, %v2309_v39, 0.0 }
 0x90e   :  { %1370 = vadd.xlane.f32.xlu0 %v1369_v40  ;;  %v1794_v40 = vld [vmem:[#allocation11 + $0x38] sm:$0xff] }
 0x924   :  { %1452 = vrot.lane.b32.xlu0 %v2596_v27, %s2492_s1  ;;  %v1561_v27 = vld [vmem:[#allocation8 + $0x8] sm:$0xff] }
 0x928   :  { %1538 = vrot.lane.b32.xlu0 %v1118_v14, %s2493_s17  ;;  %v1705_v14 = vld [vmem:[#allocation10 + $0x78] sm:$0xff] }
 0x993   :  { %v1368_v41 = vpop.xlane.xlu0 %1367 }
 0x994   :  { %2310 = vrcp.f32 %v1368_v41  ;;  %v1793_v41 = vld [vmem:[#allocation11 + $0x30] sm:$0xff] }
 0x997   :  { %v1371_v42 = vpop.xlane.xlu0 %1370 }
 0x998   :  { %2312 = vrcp.f32 %v1371_v42  ;;  %v1792_v42 = vld [vmem:[#allocation11 + $0x28] sm:$0xff] }
 0x99b   :  { %v1453_v43 = vpop.permute.xlu0 %1452 }
 0x99c   :  { %2173 = vmatpush3.msra.mxu1 %v1453_v43  ;;  %v1791_v43 = vld [vmem:[#allocation11 + $0x20] sm:$0xff] }
 0x99d   :  { %2188 = vmatprep.subr.mxu1 %v1705_v14 }
 0x99f   :  { %v1539_v57 = vpop.permute.xlu0 %1538 }
 0x9a0   :  { %v1555_v60 = vsel %vm1554_vm3, %v1552_v58, %v1539_v57  ;;  %v1680_v57 = vsub.s32 2, %v2580_v20  ;;  %v1686_v58 = vsub.s32 3, %v2580_v20 }
 0x9a1   :  { %v2311_v44 = vpop.eup %2310 }
 0x9a2   :  { %v1374_v45 = vmul.f32 %v2311_v44, %v2307_v38  ;;  %v1797_v38 = vld [vmem:[#allocation11 + $0x50] sm:$0xff]  ;;  %v1687_v1 = vrot.slane %v2590_v22, %v1686_v58 }
 0x9a4   :  { %2170 = vmatmul.mubr.msk.f32.vlgmr.msra.gmra.mxu0 %vm212_vm1, %v1374_v45 }
 0x9a5   :  { %v2313_v46 = vpop.eup %2312  ;;  %2178 = vmatpush3.msra.mxu0 %v1563_v48 }
 0x9a6   :  { %v1375_v47 = vmul.f32 %v2313_v46, %v2309_v39  ;;  %2179 = vmatprep.subr.mxu0 %v1562_v49  ;;  %v1795_v39 = vld [vmem:[#allocation11 + $0x40] sm:$0xff] }
 0x9a7   :  { %2180 = vmatpush3.msra.mxu0 %v1562_v49 }
 0x9a8   :  { %2175 = vmatmul.mubr.msk.f32.vlgmr.msra.gmra.mxu1 %vm212_vm1, %v1375_v47  ;;  %2181 = vmatprep.subr.mxu0 %v1561_v27 }
 0x9a9   :  { %2182 = vmatpush3.msra.mxu0 %v1561_v27  ;;  %2189 = vmatpush3.msra.mxu1 %v1705_v14 }
 0x9aa   :  { %2183 = vmatprep.subr.mxu0 %v1560_v50 }
 0x9ab   :  { %2184 = vmatpush3.msra.mxu0 %v1560_v50 }
 0x9ac   :  { %2223 = vmatprep.subr.mxu0 %v1802_v33 }
 0xa64   :  { %v1448_v51 = vpop.f32.mrf.mxu0 }
 0xa65   :  { %1546 = vrot.lane.b32.xlu0 %v1448_v51, %s2494_s18 }
 0xa66   :  { %v2171_v52 = vpop.f32.mrf.mxu0 }
 0xa68   :  { %v1524_v53 = vpop.f32.mrf.mxu1 }
 0xa69   :  { %1548 = vrot.lane.b32.xlu1 %v1524_v53, %s2494_s18 }
 0xa6a   :  { %v2176_v54 = vpop.f32.mrf.mxu1 }
 0xad7   :  { %v1547_v61 = vpop.permute.xlu0 %1546 }
 0xad8   :  { %v1558_v63 = vsel %vm1557_vm2, %v1555_v60, %v1547_v61  ;;  %v1681_v60 = vrot.slane %v2590_v22, %v1680_v57 }
 0xad9   :  { %2185 = vmatprep.mubr.msk.f32.mxu0 %vm1568_vm4, %v1558_v63 }
 0xadb   :  { %v1549_v3 = vpop.permute.xlu1 %1548 }
 0xadc   :  { %v1559_v5 = vsel %vm1557_vm2, %v1556_v2, %v1549_v3 }
 0xadd   :  { %2186 = vmatmul.mubr.msk.f32.vlgmr.msra.gmra.mxu0 %vm1568_vm4, %v1559_v5 }
 0xade   :  { %2224 = vmatpush3.msra.mxu0 %v1802_v33 }
 0xadf   :  { %2225 = vmatprep.subr.mxu0 %v1801_v35 }
 0xae0   :  { %2226 = vmatpush3.msra.mxu0 %v1801_v35 }
 0xae1   :  { %2227 = vmatprep.subr.mxu0 %v1800_v34 }
 0xae2   :  { %2228 = vmatpush3.msra.mxu0 %v1800_v34 }
 0xae3   :  { %2229 = vmatprep.subr.mxu0 %v1799_v36 }
 0xae4   :  { %2230 = vmatpush3.msra.mxu0 %v1799_v36 }
 0xae5   :  { %2231 = vmatprep.subr.mxu0 %v1798_v37 }
 0xae6   :  { %2232 = vmatpush3.msra.mxu0 %v1798_v37 }
 0xae7   :  { %2233 = vmatprep.subr.mxu0 %v1797_v38 }
 0xae8   :  { %2234 = vmatpush3.msra.mxu0 %v1797_v38 }
 0xae9   :  { %2235 = vmatprep.subr.mxu0 %v1796_v26 }
 0xaea   :  { %2236 = vmatpush3.msra.mxu0 %v1796_v26 }
 0xaeb   :  { %2237 = vmatprep.subr.mxu0 %v1795_v39 }
 0xaec   :  { %2238 = vmatpush3.msra.mxu0 %v1795_v39 }
 0xaed   :  { %2239 = vmatprep.subr.mxu0 %v1794_v40 }
 0xaee   :  { %2240 = vmatpush3.msra.mxu0 %v1794_v40 }
 0xaef   :  { %2241 = vmatprep.subr.mxu0 %v1793_v41 }
 0xaf0   :  { %2242 = vmatpush3.msra.mxu0 %v1793_v41 }
 0xaf1   :  { %2243 = vmatprep.subr.mxu0 %v1792_v42 }
 0xaf2   :  { %2244 = vmatpush3.msra.mxu0 %v1792_v42 }
 0xaf3   :  { %2245 = vmatprep.subr.mxu0 %v1791_v43 }
 0xaf4   :  { %2246 = vmatpush3.msra.mxu0 %v1791_v43 }
 0xb9d   :  { %v2187_v8 = vpop.f32.mrf.mxu0 }
 0xb9e   :  { %v1647_v62 = vadd.f32 %v2187_v8, %v1567_v7 }
 0xb9f   :  { %v1641_v9 = vpop.f32.mrf.mxu0 }
 0xba0   :  { %v2734_v10 = vadd.f32 %v1647_v62, %v2575_v17  ;;  %v1642_v11 = vadd.f32 %v1641_v9, %v1567_v7  ;;  %v1704_v17 = vld [vmem:[#allocation10 + $0x70] sm:$0xff]  ;;  %v1790_v9 = vld [vmem:[#allocation11 + $0x18] sm:$0xff] }
 0xba1   :  { %2190 = vmatprep.subr.mxu1 %v1704_v17  ;;  %2247 = vmatprep.subr.mxu0 %v1790_v9 }
 0xba2   :  { %v2737_v12 = vadd.f32 %v1642_v11, %v2572_v4  ;;  %1654 = vadd.xlane.f32.xlu1 %v2734_v10  ;;  %v1659_v13 = vmul.f32 %v2734_v10, %v2734_v10  ;;  %2191 = vmatpush3.msra.mxu1 %v1704_v17  ;;  %v1703_v4 = vld [vmem:[#allocation10 + $0x68] sm:$0xff]  ;;  %v1789_v11 = vld [vmem:[#allocation11 + $0x10] sm:$0xff] }
 0xba3   :  { %2192 = vmatprep.subr.mxu1 %v1703_v4  ;;  %2248 = vmatpush3.msra.mxu0 %v1790_v9 }
 0xba4   :  { %1652 = vadd.xlane.f32.xlu0 %v2737_v12  ;;  %v1658_v0 = vmul.f32 %v2737_v12, %v2737_v12  ;;  %2193 = vmatpush3.msra.mxu1 %v1703_v4 }
 0xba5   :  { %2194 = vmatprep.subr.mxu1 %v1702_v15  ;;  %2249 = vmatprep.subr.mxu0 %v1789_v11 }
 0xba6   :  { %2195 = vmatpush3.msra.mxu1 %v1702_v15  ;;  %2250 = vmatpush3.msra.mxu0 %v1789_v11 }
 0xba7   :  { %2196 = vmatprep.subr.mxu1 %v1701_v16 }
 0xba8   :  { %1660 = vadd.xlane.f32.xlu0 %v1658_v0  ;;  %2197 = vmatpush3.msra.mxu1 %v1701_v16  ;;  %v1787_v0 = vld [vmem:[#allocation11] sm:$0xff] }
 0xba9   :  { %2198 = vmatprep.subr.mxu1 %v1700_v19 }
 0xbaa   :  { %2199 = vmatpush3.msra.mxu1 %v1700_v19 }
 0xbab   :  { %2200 = vmatprep.subr.mxu1 %v1699_v21 }
 0xbac   :  { %1662 = vadd.xlane.f32.xlu0 %v1659_v13  ;;  %2201 = vmatpush3.msra.mxu1 %v1699_v21  ;;  %v1805_v21 = vsub.s32 5, %v2580_v20 }
 0xbad   :  { %2202 = vmatprep.subr.mxu1 %v1698_v23 }
 0xbae   :  { %2203 = vmatpush3.msra.mxu1 %v1698_v23  ;;  %v1806_v23 = vrot.slane %v2590_v22, %v1805_v21 }
 0xbaf   :  { %2204 = vmatprep.subr.mxu1 %v1697_v24 }
 0xbb0   :  { %2205 = vmatpush3.msra.mxu1 %v1697_v24 }
 0xbb1   :  { %2206 = vmatprep.subr.mxu1 %v1696_v25 }
 0xbb2   :  { %2207 = vmatpush3.msra.mxu1 %v1696_v25 }
 0xbb3   :  { %2208 = vmatprep.subr.mxu1 %v1695_v28 }
 0xbb4   :  { %2209 = vmatpush3.msra.mxu1 %v1695_v28 }
 0xbb5   :  { %2210 = vmatprep.subr.mxu1 %v1694_v29 }
 0xbb6   :  { %2211 = vmatpush3.msra.mxu1 %v1694_v29 }
 0xbb7   :  { %2212 = vmatprep.subr.mxu1 %v1693_v31 }
 0xbb8   :  { %2213 = vmatpush3.msra.mxu1 %v1693_v31 }
 0xbb9   :  { %2214 = vmatprep.subr.mxu1 %v1692_v32 }
 0xbba   :  { %2215 = vmatpush3.msra.mxu1 %v1692_v32 }
 0xbbb   :  { %2216 = vmatprep.subr.mxu1 %v1691_v18 }
 0xbbc   :  { %2217 = vmatpush3.msra.mxu1 %v1691_v18 }
 0xbbd   :  { %2218 = vmatprep.subr.mxu1 %v1690_v30 }
 0xbbe   :  { %2219 = vmatpush3.msra.mxu1 %v1690_v30 }
 0xc2b   :  { %v1655_v46 = vpop.xlane.xlu1 %1654 }
 0xc2c   :  { %v1657_v48 = vmul.f32 0.03125, %v1655_v46  ;;  %v1912_v46 = vsub.s32 6, %v2580_v20 }
 0xc2d   :  { %v1653_v44 = vpop.xlane.xlu0 %1652 }
 0xc2e   :  { %v1656_v45 = vmul.f32 0.03125, %v1653_v44  ;;  %v1667_v52 = vmul.f32 %v1657_v48, %v1657_v48  ;;  %v1675_v2 = vsub.f32 %v2734_v10, %v1657_v48  ;;  %v1708_v10 = vsub.s32 4, %v2580_v20 }
 0xc30   :  { %v1666_v49 = vmul.f32 %v1656_v45, %v1656_v45  ;;  %v1674_v59 = vsub.f32 %v2737_v12, %v1656_v45  ;;  %v1788_v12 = vld [vmem:[#allocation11 + $0x8] sm:$0xff]  ;;  %v1709_v13 = vrot.slane %v2590_v22, %v1708_v10 }
 0xc31   :  { %v1661_v47 = vpop.xlane.xlu0 %1660  ;;  %2251 = vmatprep.subr.mxu0 %v1788_v12 }
 0xc32   :  { %v1664_v27 = vmul.f32 0.03125, %v1661_v47  ;;  %2252 = vmatpush3.msra.mxu0 %v1788_v12  ;;  %v1918_v47 = vsub.s32 7, %v2580_v20 }
 0xc33   :  { %2253 = vmatprep.subr.mxu0 %v1787_v0 }
 0xc34   :  { %v1668_v50 = vsub.f32 %v1664_v27, %v1666_v49  ;;  %2254 = vmatpush3.msra.mxu0 %v1787_v0  ;;  %v1913_v49 = vrot.slane %v2590_v22, %v1912_v46 }
 0xc35   :  { %v1663_v51 = vpop.xlane.xlu0 %1662 }
 0xc36   :  { %v1670_v53 = vadd.f32 1e-05, %v1668_v50  ;;  %v1665_v54 = vmul.f32 0.03125, %v1663_v51 }
 0xc38   :  { %2314 = vrsqrt.f32 %v1670_v53  ;;  %v1669_v55 = vsub.f32 %v1665_v54, %v1667_v52  ;;  %v1919_v52 = vrot.slane %v2590_v22, %v1918_v47 }
 0xc3a   :  { %v1671_v56 = vadd.f32 1e-05, %v1669_v55 }
 0xc3c   :  { %2316 = vrsqrt.f32 %v1671_v56 }
 0xc45   :  { %v2315_v61 = vpop.eup %2314 }
 0xc46   :  { %v1676_v63 = vmul.f32 %v2315_v61, %v1674_v59 }
 0xc48   :  { %v1682_v3 = vmul.f32 %v1681_v60, %v1676_v63 }
 0xc49   :  { %v2317_v5 = vpop.eup %2316 }
 0xc4a   :  { %v1688_v6 = vadd.f32 %v1687_v1, %v1682_v3  ;;  %v1677_v7 = vmul.f32 %v2317_v5, %v1675_v2 }
 0xc4c   :  { %2220 = vmatprep.mubr.f32.mxu1 %v1688_v6  ;;  %v1683_v8 = vmul.f32 %v1681_v60, %v1677_v7 }
 0xc4e   :  { %v1689_v62 = vadd.f32 %v1687_v1, %v1683_v8 }
 0xc50   :  { %2221 = vmatmul.mubr.f32.vlgmr.msra.gmra.mxu1 %v1689_v62 }
 0xd10   :  { %v2222_v14 = vpop.f32.mrf.mxu1 }
 0xd11   :  { %v1782_v17 = vadd.f32 %v2222_v14, %v1709_v13 }
 0xd12   :  { %v1776_v4 = vpop.f32.mrf.mxu1 }
 0xd13   :  { %v1777_v15 = vadd.f32 %v1776_v4, %v1709_v13  ;;  %v1786_v19 = vmax.f32 %v1782_v17, 0.0 }
 0xd15   :  { %v1785_v16 = vmax.f32 %v1777_v15, 0.0 }
 0xd17   :  { %2255 = vmatprep.mubr.f32.mxu0 %v1785_v16 }
 0xd18   :  { %2256 = vmatmul.mubr.f32.vlgmr.msra.gmra.mxu0 %v1786_v19 }
 0xdd8   :  { %v2257_v24 = vpop.f32.mrf.mxu0 }
 0xdd9   :  { %v1879_v25 = vadd.f32 %v2257_v24, %v1806_v23 }
 0xdda   :  { %v1873_v28 = vpop.f32.mrf.mxu0 }
 0xddb   :  { %v1883_v29 = vadd.f32 %v1879_v25, %v1689_v62  ;;  %v1874_v31 = vadd.f32 %v1873_v28, %v1806_v23 }
 0xddd   :  { %v1882_v32 = vadd.f32 %v1874_v31, %v1688_v6  ;;  %1886 = vadd.xlane.f32.xlu0 %v1883_v29  ;;  %v1891_v18 = vmul.f32 %v1883_v29, %v1883_v29 }
 0xddf   :  { %1884 = vadd.xlane.f32.xlu1 %v1882_v32  ;;  %v1890_v30 = vmul.f32 %v1882_v32, %v1882_v32 }
 0xde1   :  { %1894 = vadd.xlane.f32.xlu0 %v1891_v18 }
 0xde3   :  { %1892 = vadd.xlane.f32.xlu1 %v1890_v30 }
 0xe66   :  { %v1887_v33 = vpop.xlane.xlu0 %1886 }
 0xe67   :  { %v1889_v35 = vmul.f32 0.03125, %v1887_v33 }
 0xe68   :  { %v1885_v34 = vpop.xlane.xlu1 %1884 }
 0xe69   :  { %v1888_v36 = vmul.f32 0.03125, %v1885_v34  ;;  %v1899_v38 = vmul.f32 %v1889_v35, %v1889_v35  ;;  %v1907_v48 = vsub.f32 %v1883_v29, %v1889_v35 }
 0xe6a   :  { %v1895_v37 = vpop.xlane.xlu0 %1894 }
 0xe6b   :  { %v1897_v26 = vmul.f32 0.03125, %v1895_v37  ;;  %v1898_v40 = vmul.f32 %v1888_v36, %v1888_v36  ;;  %v1906_v50 = vsub.f32 %v1882_v32, %v1888_v36 }
 0xe6c   :  { %v1893_v39 = vpop.xlane.xlu1 %1892 }
 0xe6d   :  { %v1901_v41 = vsub.f32 %v1897_v26, %v1899_v38  ;;  %v1896_v42 = vmul.f32 0.03125, %v1893_v39 }
 0xe6f   :  { %v1903_v43 = vadd.f32 1e-05, %v1901_v41  ;;  %v1900_v44 = vsub.f32 %v1896_v42, %v1898_v40 }
 0xe71   :  { %2318 = vrsqrt.f32 %v1903_v43  ;;  %v1902_v45 = vadd.f32 1e-05, %v1900_v44 }
 0xe73   :  { %2320 = vrsqrt.f32 %v1902_v45 }
 0xe7e   :  { %v2319_v27 = vpop.eup %2318 }
 0xe7f   :  { %v1909_v51 = vmul.f32 %v2319_v27, %v1907_v48 }
 0xe80   :  { %v2321_v53 = vpop.eup %2320 }
 0xe81   :  { %v1908_v54 = vmul.f32 %v2321_v53, %v1906_v50  ;;  %v1915_v55 = vmul.f32 %v1913_v49, %v1909_v51 }
 0xe83   :  { %v1914_v56 = vmul.f32 %v1913_v49, %v1908_v54  ;;  %v1921_v57 = vadd.f32 %v1919_v52, %v1915_v55 }
 0xe85   :  { %v1920_v58 = vadd.f32 %v1919_v52, %v1914_v56  ;;  %1923 = vst [vmem:[#allocation13 + $0x8] sm:$0xff] %v1921_v57 }
 0xe87   :  { %1922 = vst [vmem:[#allocation13] sm:$0xff] %v1920_v58 }
 0xe88   :  { %2453 = shalt.err (!%p2450_p6)
}
 0xe89   :  { %1935 = dma.vmem_to_hbm [thread:$0]  %s1930_s19, 256, %s2772_s7, [#allocation4], %s2474_s29, %s2474_s29, %s2475_s30  }
 0xe8a   :  { %2470 = dma.done.wait [#allocation4], 256  }
 0xe8b   :  { %2471 = vsyncadd [#allocation4], 4294967040 }
 0xe8c   :  { %1939 = vsyncpa [#allocation3], 1 }
 0xe8d   :  { %1940 = vsyncpa [#allocation6], 1 }
 0xe8e   :  { %1941 = vsyncpa [#allocation9], 1 }
 0xe8f   :  { %1942 = vsyncpa [#allocation12], 1 }
 0xe90   :  { %1943 = vsyncpa [#allocation4], 1 }

</bundles_post_ra>
